<compile_context>
chip_gen: v7x
topology: tpu7x:2x2x1
jax: 0.10.0
libtpu: 0.0.40
codegen_flags: <defaults>
</compile_context>

<pallas_src>
import functools

import jax
import jax.numpy as jnp
from jax.experimental import pallas as pl
from jax.experimental.pallas import tpu as pltpu

# Logical (PyTorch) feature dims; hidden/latent are padded to lane multiples.
D_IN = 784           # 784 = 98 * 8  (sublane aligned, used unpadded)
D_H, D_H_P = 400, 512
D_Z, D_Z_P = 50, 128


def _round_up(n, m):
    return (n + m - 1) // m * m


def vae_forward_kernel(x_ref, e_ref,
                       w1_ref, b1_ref,
                       w2_ref, b2_ref,
                       w3_ref, b3_ref,
                       w4_ref, b4_ref,
                       o_ref):
    """One batch tile of the full VAE forward (encode + reparam + decode)."""
    x = x_ref[...].astype(jnp.bfloat16)                                  # (TB, 784)

    # fc1 + ReLU
    h1 = jnp.dot(x, w1_ref[...], preferred_element_type=jnp.float32) + b1_ref[...]
    h1 = jnp.maximum(h1, 0.0).astype(jnp.bfloat16)                       # (TB, 512)

    # fc2 — the module uses the same layer for u and s, so u == s.
    u = jnp.dot(h1, w2_ref[...], preferred_element_type=jnp.float32) + b2_ref[...]

    # reparameterization: z = u + s*e = u + u*e   (padded cols of u are 0)
    z = (u + u * e_ref[...]).astype(jnp.bfloat16)                        # (TB, 128)

    # fc3 + ReLU
    h3 = jnp.dot(z, w3_ref[...], preferred_element_type=jnp.float32) + b3_ref[...]
    h3 = jnp.maximum(h3, 0.0).astype(jnp.bfloat16)                       # (TB, 512)

    # fc4 + sigmoid (exp/reciprocal live on the otherwise-idle EUP slot)
    logits = jnp.dot(h3, w4_ref[...], preferred_element_type=jnp.float32) + b4_ref[...]
    o_ref[...] = jax.nn.sigmoid(logits).astype(o_ref.dtype)              # (TB, 784) bf16


@functools.partial(jax.jit, static_argnames=("tile_b",))
def vae_forward(x_nchw, e, params, tile_b=512):
    """Flatten NCHW input and run the fused VAE forward kernel.

    x_nchw: (B, 1, 28, 28) float32.   e: (B, 50) float32 reparam noise.
    Returns (B, 784) bfloat16 reconstructions.
    """
    (w1, b1, w2, b2, w3, b3, w4, b4) = params
    b = x_nchw.shape[0]

    # Batch tile: multiple of 8, at most tile_b, and chosen so that large
    # batches produce >= 2 grid tiles (lets "parallel" shard across 2 TCs).
    tile_b = _round_up(tile_b, 8)
    tb = min(tile_b, _round_up(-(-b // 2), 8))
    b_pad = _round_up(b, tb)

    x_flat = x_nchw.reshape(b, D_IN)                       # free metadata reshape
    if b_pad != b:
        x_flat = jnp.pad(x_flat, ((0, b_pad - b), (0, 0)))
    # Noise padded to (b_pad, 128) bf16; padded cols are harmless (u there is 0).
    e_p = jnp.zeros((b_pad, D_Z_P), jnp.bfloat16).at[:b, :D_Z].set(e.astype(jnp.bfloat16))

    act_spec = lambda cols: pl.BlockSpec((tb, cols), lambda i: (i, 0))
    # Constant index map -> fetched once, VMEM-resident across the batch grid.
    res_spec = lambda shape: pl.BlockSpec(shape, lambda i: (0, 0))

    out = pl.pallas_call(
        vae_forward_kernel,
        out_shape=jax.ShapeDtypeStruct((b_pad, D_IN), jnp.bfloat16),
        grid=(b_pad // tb,),
        in_specs=[
            act_spec(D_IN),                                 # x  (f32, cast in-kernel)
            act_spec(D_Z_P),                                # e  (bf16 reparam noise)
            res_spec((D_IN, D_H_P)),  res_spec((1, D_H_P)),  # fc1
            res_spec((D_H_P, D_Z_P)), res_spec((1, D_Z_P)),  # fc2
            res_spec((D_Z_P, D_H_P)), res_spec((1, D_H_P)),  # fc3
            res_spec((D_H_P, D_IN)),  res_spec((1, D_IN)),   # fc4
        ],
        out_specs=act_spec(D_IN),
        compiler_params=pltpu.CompilerParams(
            dimension_semantics=("parallel",),   # shard batch tiles across TCs
            vmem_limit_bytes=32 << 20,           # ~15 MiB footprint at TB=512
        ),
    )(x_flat, e_p, w1, b1, w2, b2, w3, b3, w4, b4)

    return out if b_pad == b else out[:b]


def init_linear(key, fan_in, fan_out, pad_in, pad_out):
    """PyTorch nn.Linear default init U(-1/sqrt(fan_in), 1/sqrt(fan_in)).

    Weight stored (in, out) (transposed vs. PyTorch), zero-padded to
    (pad_in, pad_out), bf16.  Bias stored (1, pad_out) f32.
    """
    kw, kb = jax.random.split(key)
    bound = 1.0 / jnp.sqrt(jnp.float32(fan_in))
    w = jax.random.uniform(kw, (fan_in, fan_out), jnp.float32, -bound, bound)
    b = jax.random.uniform(kb, (1, fan_out), jnp.float32, -bound, bound)
    w_p = (jnp.zeros((pad_in, pad_out), jnp.float32)
           .at[:fan_in, :fan_out].set(w).astype(jnp.bfloat16))
    b_p = jnp.zeros((1, pad_out), jnp.float32).at[:, :fan_out].set(b)
    return w_p, b_p


if __name__ == "__main__":
    key = jax.random.PRNGKey(0)
    k_x, k_e, k1, k2, k3, k4 = jax.random.split(key, 6)

    # Small module-consistent shapes: batch=2, MNIST-style 1x28x28 (=784).
    B = 2
    x = jax.random.normal(k_x, (B, 1, 28, 28), jnp.float32)
    e = jax.random.normal(k_e, (B, D_Z), jnp.float32)      # torch.randn analogue

    params = (
        *init_linear(k1, D_IN, D_H, D_IN,  D_H_P),   # fc1 (784 -> 512pad)
        *init_linear(k2, D_H,  D_Z, D_H_P, D_Z_P),   # fc2 (used for u and s)
        *init_linear(k3, D_Z,  D_H, D_Z_P, D_H_P),   # fc3
        *init_linear(k4, D_H,  D_IN, D_H_P, D_IN),   # fc4 (512pad -> 784)
    )

    out = vae_forward(x, e, params)
    out = jax.block_until_ready(out)
    assert out.shape == (B, D_IN) and out.dtype == jnp.bfloat16

    # Pure-JAX reference mirroring the kernel's bf16-in / f32-accumulate math.
    (w1, b1, w2, b2, w3, b3, w4, b4) = params
    xb = x.reshape(B, D_IN).astype(jnp.bfloat16)
    ep = jnp.zeros((B, D_Z_P), jnp.float32).at[:, :D_Z].set(e)
    h1 = jnp.maximum(jnp.dot(xb, w1, preferred_element_type=jnp.float32) + b1,
                     0.0).astype(jnp.bfloat16)
    u = jnp.dot(h1, w2, preferred_element_type=jnp.float32) + b2
    z = (u + u * ep).astype(jnp.bfloat16)
    h3 = jnp.maximum(jnp.dot(z, w3, preferred_element_type=jnp.float32) + b3,
                     0.0).astype(jnp.bfloat16)
    ref = jax.nn.sigmoid(jnp.dot(h3, w4, preferred_element_type=jnp.float32) + b4)

    max_err = float(jnp.max(jnp.abs(out.astype(jnp.float32) - ref)))
    # bf16 output quantization (~4e-3 rel) + MXU vs XLA reduction-order noise.
    assert jnp.allclose(out.astype(jnp.float32), ref, atol=1e-2, rtol=1e-2), max_err

    print("KERNEL_OK")
</pallas_src>

<mosaic_0001>
module attributes {stable_mosaic.version = 11 : i64} {
  func.func @vae_forward_kernel(%arg0: i32, %arg1: memref<8x784xf32, #tpu.memory_space<vmem>>, %arg2: memref<8x128xbf16, #tpu.memory_space<vmem>>, %arg3: memref<784x512xbf16, #tpu.memory_space<vmem>>, %arg4: memref<1x512xf32, #tpu.memory_space<vmem>>, %arg5: memref<512x128xbf16, #tpu.memory_space<vmem>>, %arg6: memref<1x128xf32, #tpu.memory_space<vmem>>, %arg7: memref<128x512xbf16, #tpu.memory_space<vmem>>, %arg8: memref<1x512xf32, #tpu.memory_space<vmem>>, %arg9: memref<512x784xbf16, #tpu.memory_space<vmem>>, %arg10: memref<1x784xf32, #tpu.memory_space<vmem>>, %arg11: memref<8x784xbf16, #tpu.memory_space<vmem>>) attributes {dimension_semantics = [#tpu.dimension_semantics<parallel>], iteration_bounds = array<i64: 1>, scalar_prefetch = 0 : i64, scratch_operands = 0 : i64, tpu.core_type = #tpu.core_type<tc>, window_params = [{transform_indices = @transform_0, window_bounds = array<i64: 8, 784>}, {transform_indices = @transform_1, window_bounds = array<i64: 8, 128>}, {pipeline_mode = #tpu.pipeline_mode<synchronous>, transform_indices = @transform_2, window_bounds = array<i64: 784, 512>}, {pipeline_mode = #tpu.pipeline_mode<synchronous>, transform_indices = @transform_3, window_bounds = array<i64: 1, 512>}, {pipeline_mode = #tpu.pipeline_mode<synchronous>, transform_indices = @transform_4, window_bounds = array<i64: 512, 128>}, {pipeline_mode = #tpu.pipeline_mode<synchronous>, transform_indices = @transform_5, window_bounds = array<i64: 1, 128>}, {pipeline_mode = #tpu.pipeline_mode<synchronous>, transform_indices = @transform_6, window_bounds = array<i64: 128, 512>}, {pipeline_mode = #tpu.pipeline_mode<synchronous>, transform_indices = @transform_7, window_bounds = array<i64: 1, 512>}, {pipeline_mode = #tpu.pipeline_mode<synchronous>, transform_indices = @transform_8, window_bounds = array<i64: 512, 784>}, {pipeline_mode = #tpu.pipeline_mode<synchronous>, transform_indices = @transform_9, window_bounds = array<i64: 1, 784>}, {transform_indices = @transform_10, window_bounds = array<i64: 8, 784>}]} {
    %c0 = arith.constant 0 : index
    %c0_0 = arith.constant 0 : index
    %0 = vector.load %arg1[%c0, %c0_0] : memref<8x784xf32, #tpu.memory_space<vmem>>, vector<8x784xf32>
    %1 = arith.truncf %0 : vector<8x784xf32> to vector<8x784xbf16>
    %c0_1 = arith.constant 0 : index
    %c0_2 = arith.constant 0 : index
    %2 = vector.load %arg3[%c0_1, %c0_2] : memref<784x512xbf16, #tpu.memory_space<vmem>>, vector<784x512xbf16>
    %cst = arith.constant dense<0.000000e+00> : vector<8x512xf32>
    %3 = tpu.matmul %1, %2, %cst {dimension_numbers = #tpu.dot_dimension_numbers<[1], [0], [0], [1], [0, 0, 1, 1], [], []>} : vector<8x784xbf16>, vector<784x512xbf16>, vector<8x512xf32> -> vector<8x512xf32>
    %c0_3 = arith.constant 0 : index
    %c0_4 = arith.constant 0 : index
    %4 = vector.load %arg4[%c0_3, %c0_4] : memref<1x512xf32, #tpu.memory_space<vmem>>, vector<1x512xf32>
    %5 = vector.broadcast %4 : vector<1x512xf32> to vector<8x512xf32>
    %6 = arith.addf %3, %5 : vector<8x512xf32>
    %cst_5 = arith.constant 0.000000e+00 : f32
    %7 = vector.broadcast %cst_5 : f32 to vector<8x512xf32>
    %8 = arith.maximumf %6, %7 : vector<8x512xf32>
    %9 = arith.truncf %8 : vector<8x512xf32> to vector<8x512xbf16>
    %c0_6 = arith.constant 0 : index
    %c0_7 = arith.constant 0 : index
    %10 = vector.load %arg5[%c0_6, %c0_7] : memref<512x128xbf16, #tpu.memory_space<vmem>>, vector<512x128xbf16>
    %cst_8 = arith.constant dense<0.000000e+00> : vector<8x128xf32>
    %11 = tpu.matmul %9, %10, %cst_8 {dimension_numbers = #tpu.dot_dimension_numbers<[1], [0], [0], [1], [0, 0, 1, 1], [], []>} : vector<8x512xbf16>, vector<512x128xbf16>, vector<8x128xf32> -> vector<8x128xf32>
    %c0_9 = arith.constant 0 : index
    %c0_10 = arith.constant 0 : index
    %12 = vector.load %arg6[%c0_9, %c0_10] : memref<1x128xf32, #tpu.memory_space<vmem>>, vector<1x128xf32>
    %13 = vector.broadcast %12 : vector<1x128xf32> to vector<8x128xf32>
    %14 = arith.addf %11, %13 : vector<8x128xf32>
    %c0_11 = arith.constant 0 : index
    %c0_12 = arith.constant 0 : index
    %15 = vector.load %arg2[%c0_11, %c0_12] : memref<8x128xbf16, #tpu.memory_space<vmem>>, vector<8x128xbf16>
    %16 = arith.extf %15 : vector<8x128xbf16> to vector<8x128xf32>
    %17 = arith.mulf %14, %16 : vector<8x128xf32>
    %18 = arith.addf %14, %17 : vector<8x128xf32>
    %19 = arith.truncf %18 : vector<8x128xf32> to vector<8x128xbf16>
    %c0_13 = arith.constant 0 : index
    %c0_14 = arith.constant 0 : index
    %20 = vector.load %arg7[%c0_13, %c0_14] : memref<128x512xbf16, #tpu.memory_space<vmem>>, vector<128x512xbf16>
    %cst_15 = arith.constant dense<0.000000e+00> : vector<8x512xf32>
    %21 = tpu.matmul %19, %20, %cst_15 {dimension_numbers = #tpu.dot_dimension_numbers<[1], [0], [0], [1], [0, 0, 1, 1], [], []>} : vector<8x128xbf16>, vector<128x512xbf16>, vector<8x512xf32> -> vector<8x512xf32>
    %c0_16 = arith.constant 0 : index
    %c0_17 = arith.constant 0 : index
    %22 = vector.load %arg8[%c0_16, %c0_17] : memref<1x512xf32, #tpu.memory_space<vmem>>, vector<1x512xf32>
    %23 = vector.broadcast %22 : vector<1x512xf32> to vector<8x512xf32>
    %24 = arith.addf %21, %23 : vector<8x512xf32>
    %cst_18 = arith.constant 0.000000e+00 : f32
    %25 = vector.broadcast %cst_18 : f32 to vector<8x512xf32>
    %26 = arith.maximumf %24, %25 : vector<8x512xf32>
    %27 = arith.truncf %26 : vector<8x512xf32> to vector<8x512xbf16>
    %c0_19 = arith.constant 0 : index
    %c0_20 = arith.constant 0 : index
    %28 = vector.load %arg9[%c0_19, %c0_20] : memref<512x784xbf16, #tpu.memory_space<vmem>>, vector<512x784xbf16>
    %cst_21 = arith.constant dense<0.000000e+00> : vector<8x784xf32>
    %29 = tpu.matmul %27, %28, %cst_21 {dimension_numbers = #tpu.dot_dimension_numbers<[1], [0], [0], [1], [0, 0, 1, 1], [], []>} : vector<8x512xbf16>, vector<512x784xbf16>, vector<8x784xf32> -> vector<8x784xf32>
    %c0_22 = arith.constant 0 : index
    %c0_23 = arith.constant 0 : index
    %30 = vector.load %arg10[%c0_22, %c0_23] : memref<1x784xf32, #tpu.memory_space<vmem>>, vector<1x784xf32>
    %31 = vector.broadcast %30 : vector<1x784xf32> to vector<8x784xf32>
    %32 = arith.addf %29, %31 : vector<8x784xf32>
    %33 = arith.negf %32 : vector<8x784xf32>
    %34 = math.exp %33 : vector<8x784xf32>
    %cst_24 = arith.constant 1.000000e+00 : f32
    %35 = vector.broadcast %cst_24 : f32 to vector<8x784xf32>
    %36 = arith.addf %35, %34 : vector<8x784xf32>
    %37 = arith.divf %35, %36 : vector<8x784xf32>
    %38 = arith.truncf %37 : vector<8x784xf32> to vector<8x784xbf16>
    %c0_25 = arith.constant 0 : index
    %c0_26 = arith.constant 0 : index
    %39 = vector.load %arg11[%c0_25, %c0_26] : memref<8x784xbf16, #tpu.memory_space<vmem>>, vector<8x784xbf16>
    tpu.vector_store %arg11[%c0_25, %c0_26], %38 {strides = array<i32>} : memref<8x784xbf16, #tpu.memory_space<vmem>>, vector<8x784xbf16>,
    return
  }
  func.func @transform_0(%arg0: i32) -> (i32, i32) {
    %c0_i32 = arith.constant 0 : i32
    %c0_i32_0 = arith.constant 0 : i32
    return %arg0, %c0_i32 : i32, i32
  }
  func.func @transform_1(%arg0: i32) -> (i32, i32) {
    %c0_i32 = arith.constant 0 : i32
    %c0_i32_0 = arith.constant 0 : i32
    return %arg0, %c0_i32 : i32, i32
  }
  func.func @transform_2(%arg0: i32) -> (i32, i32) {
    %c0_i32 = arith.constant 0 : i32
    %c0_i32_0 = arith.constant 0 : i32
    %c0_i32_1 = arith.constant 0 : i32
    return %c0_i32, %c0_i32_0 : i32, i32
  }
  func.func @transform_3(%arg0: i32) -> (i32, i32) {
    %c0_i32 = arith.constant 0 : i32
    %c0_i32_0 = arith.constant 0 : i32
    %c0_i32_1 = arith.constant 0 : i32
    return %c0_i32, %c0_i32_0 : i32, i32
  }
  func.func @transform_4(%arg0: i32) -> (i32, i32) {
    %c0_i32 = arith.constant 0 : i32
    %c0_i32_0 = arith.constant 0 : i32
    %c0_i32_1 = arith.constant 0 : i32
    return %c0_i32, %c0_i32_0 : i32, i32
  }
  func.func @transform_5(%arg0: i32) -> (i32, i32) {
    %c0_i32 = arith.constant 0 : i32
    %c0_i32_0 = arith.constant 0 : i32
    %c0_i32_1 = arith.constant 0 : i32
    return %c0_i32, %c0_i32_0 : i32, i32
  }
  func.func @transform_6(%arg0: i32) -> (i32, i32) {
    %c0_i32 = arith.constant 0 : i32
    %c0_i32_0 = arith.constant 0 : i32
    %c0_i32_1 = arith.constant 0 : i32
    return %c0_i32, %c0_i32_0 : i32, i32
  }
  func.func @transform_7(%arg0: i32) -> (i32, i32) {
    %c0_i32 = arith.constant 0 : i32
    %c0_i32_0 = arith.constant 0 : i32
    %c0_i32_1 = arith.constant 0 : i32
    return %c0_i32, %c0_i32_0 : i32, i32
  }
  func.func @transform_8(%arg0: i32) -> (i32, i32) {
    %c0_i32 = arith.constant 0 : i32
    %c0_i32_0 = arith.constant 0 : i32
    %c0_i32_1 = arith.constant 0 : i32
    return %c0_i32, %c0_i32_0 : i32, i32
  }
  func.func @transform_9(%arg0: i32) -> (i32, i32) {
    %c0_i32 = arith.constant 0 : i32
    %c0_i32_0 = arith.constant 0 : i32
    %c0_i32_1 = arith.constant 0 : i32
    return %c0_i32, %c0_i32_0 : i32, i32
  }
  func.func @transform_10(%arg0: i32) -> (i32, i32) {
    %c0_i32 = arith.constant 0 : i32
    %c0_i32_0 = arith.constant 0 : i32
    return %arg0, %c0_i32 : i32, i32
  }
}

</mosaic_0001>

<bundles_post_ra>
// kernel: vae_forward.1
= control target key start
LH: loop header
LB: loop body
LE: loop exit
PB: predicated region body
PF: predicated region fallthrough
CT: control target
= control target key end

     0   :  { %vm1248_vm0 = vcmask 130048   ;;  %vm4085_vm1 = vcmask 125952   ;;  %s7081_s2 = inlined_call_operand.vmem [shape: bf16[784,512], index: 2, kind: input, shape index: {}]   ;;  %s7082_s0 = inlined_call_operand.vmem [shape: f32[8,784], index: 0, kind: input, shape index: {}]   ;;  %s7083_s4 = inlined_call_operand.vmem [shape: bf16[512,128], index: 4, kind: input, shape index: {}]   ;;  %s7084_s3 = inlined_call_operand.vmem [shape: f32[1,512], index: 3, kind: input, shape index: {}]   ;;  %s7085_s6 = inlined_call_operand.vmem [shape: bf16[128,512], index: 6, kind: input, shape index: {}]   ;;  %s7086_s8 = inlined_call_operand.vmem [shape: bf16[512,784], index: 8, kind: input, shape index: {}]   ;;  %s7087_s5 = inlined_call_operand.vmem [shape: f32[1,128], index: 5, kind: input, shape index: {}]   ;;  %s7088_s1 = inlined_call_operand.vmem [shape: bf16[8,128], index: 1, kind: input, shape index: {}]   ;;  %s7089_s7 = inlined_call_operand.vmem [shape: f32[1,512], index: 7, kind: input, shape index: {}]   ;;  %s7090_s9 = inlined_call_operand.vmem [shape: f32[1,784], index: 9, kind: input, shape index: {}]   ;;  %s7091_s10 = inlined_call_operand.vmem [shape: bf16[8,784], index: 10, kind: output, shape index: {}]  }
   0x1   :  { %v4728_v0 = vld [vmem:[%s7081_s2 + $0x4] ss:$16 sps:$4 sm:$0xff]   ;;  %v4730_v1 = vld [vmem:[%s7081_s2 + $0xc] ss:$16 sps:$4 sm:$0xff]   ;;  %v4732_v2 = vld [vmem:[%s7081_s2] ss:$16 sps:$4 sm:$0xff]  }
   0x2   :  { %1252 = vmatprep.subr.bf16.mxu0 %v4728_v0  ;;  %v4733_v3 = vld [vmem:[%s7081_s2 + $0x8] ss:$16 sps:$4 sm:$0xff]   ;;  %1416 = vmatprep.subr.bf16.mxu1 %v4730_v1  ;;  %v4734_v4 = vld [vmem:[%s7081_s2 + $0x24] ss:$16 sps:$4 sm:$0xff]   ;;  %v4736_v5 = vld [vmem:[%s7081_s2 + $0x2c] ss:$16 sps:$4 sm:$0xff]  }
   0x3   :  { %1253 = vmatpush1.bf16.msra.mxu0 %v4732_v2  ;;  %1417 = vmatpush1.bf16.msra.mxu1 %v4733_v3  ;;  %v4738_v6 = vld [vmem:[%s7081_s2 + $0x20] ss:$16 sps:$4 sm:$0xff]   ;;  %v4739_v7 = vld [vmem:[%s7081_s2 + $0x28] ss:$16 sps:$4 sm:$0xff]   ;;  %v4740_v8 = vld [vmem:[%s7081_s2 + $0x44] ss:$16 sps:$4 sm:$0xff]  }
   0x4   :  { %1254 = vmatprep.subr.bf16.mxu0 %v4734_v4  ;;  %1418 = vmatprep.subr.bf16.mxu1 %v4736_v5  ;;  %v4742_v9 = vld [vmem:[%s7081_s2 + $0x4c] ss:$16 sps:$4 sm:$0xff]   ;;  %v4744_v10 = vld [vmem:[%s7081_s2 + $0x40] ss:$16 sps:$4 sm:$0xff]   ;;  %v4745_v11 = vld [vmem:[%s7081_s2 + $0x48] ss:$16 sps:$4 sm:$0xff]  }
   0x5   :  { %v4746_v12 = vld [vmem:[%s7081_s2 + $0x64] ss:$16 sps:$4 sm:$0xff]   ;;  %v4748_v13 = vld [vmem:[%s7081_s2 + $0x6c] ss:$16 sps:$4 sm:$0xff]   ;;  %v4750_v14 = vld [vmem:[%s7081_s2 + $0x60] ss:$16 sps:$4 sm:$0xff]  }
   0x6   :  { %v4751_v15 = vld [vmem:[%s7081_s2 + $0x68] ss:$16 sps:$4 sm:$0xff]   ;;  %v4752_v16 = vld [vmem:[%s7081_s2 + $0x84] ss:$16 sps:$4 sm:$0xff]   ;;  %v4754_v17 = vld [vmem:[%s7081_s2 + $0x8c] ss:$16 sps:$4 sm:$0xff]  }
   0x7   :  { %1255 = vmatpush1.bf16.msra.mxu0 %v4738_v6  ;;  %1419 = vmatpush1.bf16.msra.mxu1 %v4739_v7  ;;  %v4756_v18 = vld [vmem:[%s7081_s2 + $0x80] ss:$16 sps:$4 sm:$0xff]   ;;  %v4757_v19 = vld [vmem:[%s7081_s2 + $0x88] ss:$16 sps:$4 sm:$0xff]   ;;  %v4758_v20 = vld [vmem:[%s7081_s2 + $0xa4] ss:$16 sps:$4 sm:$0xff]  }
   0x8   :  { %1256 = vmatprep.subr.bf16.mxu0 %v4740_v8  ;;  %1420 = vmatprep.subr.bf16.mxu1 %v4742_v9  ;;  %v4760_v21 = vld [vmem:[%s7081_s2 + $0xac] ss:$16 sps:$4 sm:$0xff]   ;;  %v4762_v22 = vld [vmem:[%s7081_s2 + $0xa0] ss:$16 sps:$4 sm:$0xff]   ;;  %v4763_v23 = vld [vmem:[%s7081_s2 + $0xa8] ss:$16 sps:$4 sm:$0xff]  }
   0x9   :  { %v4764_v24 = vld [vmem:[%s7081_s2 + $0xc4] ss:$16 sps:$4 sm:$0xff]   ;;  %v4766_v25 = vld [vmem:[%s7081_s2 + $0xcc] ss:$16 sps:$4 sm:$0xff]   ;;  %v4768_v26 = vld [vmem:[%s7081_s2 + $0xc0] ss:$16 sps:$4 sm:$0xff]  }
   0xa   :  { %v4769_v27 = vld [vmem:[%s7081_s2 + $0xc8] ss:$16 sps:$4 sm:$0xff]   ;;  %v4770_v28 = vld [vmem:[%s7081_s2 + $0xe4] ss:$16 sps:$4 sm:$0xff]   ;;  %v4772_v29 = vld [vmem:[%s7081_s2 + $0xec] ss:$16 sps:$4 sm:$0xff]  }
   0xb   :  { %1257 = vmatpush1.bf16.msra.mxu0 %v4744_v10  ;;  %1421 = vmatpush1.bf16.msra.mxu1 %v4745_v11  ;;  %v4774_v30 = vld [vmem:[%s7081_s2 + $0xe0] ss:$16 sps:$4 sm:$0xff]   ;;  %v4775_v31 = vld [vmem:[%s7081_s2 + $0xe8] ss:$16 sps:$4 sm:$0xff]   ;;  %v4776_v32 = vld [vmem:[%s7081_s2 + $0x104] ss:$16 sps:$4 sm:$0xff]  }
   0xc   :  { %1258 = vmatprep.subr.bf16.mxu0 %v4746_v12  ;;  %1422 = vmatprep.subr.bf16.mxu1 %v4748_v13  ;;  %v4778_v33 = vld [vmem:[%s7081_s2 + $0x10c] ss:$16 sps:$4 sm:$0xff]   ;;  %v4780_v34 = vld [vmem:[%s7081_s2 + $0x100] ss:$16 sps:$4 sm:$0xff]   ;;  %v4781_v35 = vld [vmem:[%s7081_s2 + $0x108] ss:$16 sps:$4 sm:$0xff]  }
   0xd   :  { %v4782_v36 = vld [vmem:[%s7081_s2 + $0x124] ss:$16 sps:$4 sm:$0xff]   ;;  %v4784_v37 = vld [vmem:[%s7081_s2 + $0x12c] ss:$16 sps:$4 sm:$0xff]   ;;  %v4786_v38 = vld [vmem:[%s7081_s2 + $0x120] ss:$16 sps:$4 sm:$0xff]  }
   0xe   :  { %v4787_v39 = vld [vmem:[%s7081_s2 + $0x128] ss:$16 sps:$4 sm:$0xff]   ;;  %v4788_v40 = vld [vmem:[%s7081_s2 + $0x144] ss:$16 sps:$4 sm:$0xff]   ;;  %v4790_v41 = vld [vmem:[%s7081_s2 + $0x14c] ss:$16 sps:$4 sm:$0xff]  }
   0xf   :  { %1259 = vmatpush1.bf16.msra.mxu0 %v4750_v14  ;;  %1423 = vmatpush1.bf16.msra.mxu1 %v4751_v15  ;;  %v4792_v42 = vld [vmem:[%s7081_s2 + $0x140] ss:$16 sps:$4 sm:$0xff]   ;;  %v4793_v43 = vld [vmem:[%s7081_s2 + $0x148] ss:$16 sps:$4 sm:$0xff]   ;;  %v4794_v44 = vld [vmem:[%s7081_s2 + $0x164] ss:$16 sps:$4 sm:$0xff]  }
  0x10   :  { %1260 = vmatprep.subr.bf16.mxu0 %v4752_v16  ;;  %1424 = vmatprep.subr.bf16.mxu1 %v4754_v17  ;;  %v4796_v45 = vld [vmem:[%s7081_s2 + $0x16c] ss:$16 sps:$4 sm:$0xff]   ;;  %v4798_v47 = vld [vmem:[%s7081_s2 + $0x160] ss:$16 sps:$4 sm:$0xff]   ;;  %v4799_v49 = vld [vmem:[%s7081_s2 + $0x168] ss:$16 sps:$4 sm:$0xff]  }
  0x11   :  { %v37_v46 = vld [vmem:[%s7082_s0 + $0x8] sm:$0xff]  ;;  %v4800_v50 = vld [vmem:[%s7081_s2 + $0x184] ss:$16 sps:$4 sm:$0xff]   ;;  %v4804_v52 = vld [vmem:[%s7081_s2 + $0x180] ss:$16 sps:$4 sm:$0xff]  }
  0x12   :  { %v44_v48 = vpack.c.bf16 %v37_v46, %v37_v46  ;;  %v4802_v51 = vld [vmem:[%s7081_s2 + $0x18c] ss:$16 sps:$4 sm:$0xff]   ;;  %v4805_v53 = vld [vmem:[%s7081_s2 + $0x188] ss:$16 sps:$4 sm:$0xff]   ;;  %v4806_v54 = vld [vmem:[%s7081_s2 + $0x1a4] ss:$16 sps:$4 sm:$0xff]  }
  0x13   :  { %1261 = vmatpush1.bf16.msra.mxu0 %v4756_v18  ;;  %1425 = vmatpush1.bf16.msra.mxu1 %v4757_v19  ;;  %v4808_v55 = vld [vmem:[%s7081_s2 + $0x1ac] ss:$16 sps:$4 sm:$0xff]   ;;  %v4810_v56 = vld [vmem:[%s7081_s2 + $0x1a0] ss:$16 sps:$4 sm:$0xff]   ;;  %v4811_v57 = vld [vmem:[%s7081_s2 + $0x1a8] ss:$16 sps:$4 sm:$0xff]  }
  0x14   :  { %1262 = vmatprep.subr.bf16.mxu0 %v4758_v20  ;;  %1426 = vmatprep.subr.bf16.mxu1 %v4760_v21  ;;  %v4812_v58 = vld [vmem:[%s7081_s2 + $0x1c4] ss:$16 sps:$4 sm:$0xff]   ;;  %v4814_v59 = vld [vmem:[%s7081_s2 + $0x1cc] ss:$16 sps:$4 sm:$0xff]   ;;  %v4816_v60 = vld [vmem:[%s7081_s2 + $0x1c0] ss:$16 sps:$4 sm:$0xff]  }
  0x15   :  { %1284 = vmatprep.mubr.bf16.mxu0 %v44_v48  ;;  %1448 = vmatprep.mubr.bf16.mxu1 %v44_v48  ;;  %v4817_v61 = vld [vmem:[%s7081_s2 + $0x1c8] ss:$16 sps:$4 sm:$0xff]   ;;  %v4818_v62 = vld [vmem:[%s7081_s2 + $0x1e4] ss:$16 sps:$4 sm:$0xff]   ;;  %v4820_v63 = vld [vmem:[%s7081_s2 + $0x1ec] ss:$16 sps:$4 sm:$0xff]  }
  0x16   :  { %v4822_v0 = vld [vmem:[%s7081_s2 + $0x1e0] ss:$16 sps:$4 sm:$0xff]   ;;  %v4823_v1 = vld [vmem:[%s7081_s2 + $0x1e8] ss:$16 sps:$4 sm:$0xff]   ;;  %v4826_v3 = vld [vmem:[%s7081_s2 + $0x204] ss:$16 sps:$4 sm:$0xff]  }
  0x17   :  { %1263 = vmatpush1.bf16.msra.mxu0 %v4762_v22  ;;  %1427 = vmatpush1.bf16.msra.mxu1 %v4763_v23  ;;  %v36_v2 = vld [vmem:[%s7082_s0] sm:$0xff]  ;;  %v4829_v4 = vld [vmem:[%s7081_s2 + $0x20c] ss:$16 sps:$4 sm:$0xff]   ;;  %v4827_v7 = vld [vmem:[%s7081_s2 + $0x208] ss:$16 sps:$4 sm:$0xff]  }
  0x18   :  { %1264 = vmatprep.subr.bf16.mxu0 %v4764_v24  ;;  %1428 = vmatprep.subr.bf16.mxu1 %v4766_v25  ;;  %v43_v5 = vpack.c.bf16 %v36_v2, %v36_v2  ;;  %v4824_v6 = vld [vmem:[%s7081_s2 + $0x200] ss:$16 sps:$4 sm:$0xff]   ;;  %v4832_v8 = vld [vmem:[%s7081_s2 + $0x224] ss:$16 sps:$4 sm:$0xff]   ;;  %v4835_v9 = vld [vmem:[%s7081_s2 + $0x22c] ss:$16 sps:$4 sm:$0xff]  }
  0x19   :  { %v4830_v10 = vld [vmem:[%s7081_s2 + $0x220] ss:$16 sps:$4 sm:$0xff]   ;;  %v4833_v11 = vld [vmem:[%s7081_s2 + $0x228] ss:$16 sps:$4 sm:$0xff]   ;;  %v4838_v12 = vld [vmem:[%s7081_s2 + $0x244] ss:$16 sps:$4 sm:$0xff]  }
  0x1a   :  { %v4841_v13 = vld [vmem:[%s7081_s2 + $0x24c] ss:$16 sps:$4 sm:$0xff]   ;;  %v4836_v14 = vld [vmem:[%s7081_s2 + $0x240] ss:$16 sps:$4 sm:$0xff]   ;;  %v4839_v15 = vld [vmem:[%s7081_s2 + $0x248] ss:$16 sps:$4 sm:$0xff]  }
  0x1b   :  { %1265 = vmatpush1.bf16.msra.mxu0 %v4768_v26  ;;  %1429 = vmatpush1.bf16.msra.mxu1 %v4769_v27  ;;  %v4844_v16 = vld [vmem:[%s7081_s2 + $0x264] ss:$16 sps:$4 sm:$0xff]   ;;  %v4847_v17 = vld [vmem:[%s7081_s2 + $0x26c] ss:$16 sps:$4 sm:$0xff]   ;;  %v4842_v18 = vld [vmem:[%s7081_s2 + $0x260] ss:$16 sps:$4 sm:$0xff]  }
  0x1c   :  { %1266 = vmatprep.subr.bf16.mxu0 %v4770_v28  ;;  %1430 = vmatprep.subr.bf16.mxu1 %v4772_v29  ;;  %v4845_v19 = vld [vmem:[%s7081_s2 + $0x268] ss:$16 sps:$4 sm:$0xff]   ;;  %v4850_v20 = vld [vmem:[%s7081_s2 + $0x284] ss:$16 sps:$4 sm:$0xff]   ;;  %v4853_v21 = vld [vmem:[%s7081_s2 + $0x28c] ss:$16 sps:$4 sm:$0xff]  }
  0x1d   :  { %v4848_v22 = vld [vmem:[%s7081_s2 + $0x280] ss:$16 sps:$4 sm:$0xff]   ;;  %v4851_v23 = vld [vmem:[%s7081_s2 + $0x288] ss:$16 sps:$4 sm:$0xff]   ;;  %v4856_v24 = vld [vmem:[%s7081_s2 + $0x2a4] ss:$16 sps:$4 sm:$0xff]  }
  0x1e   :  { %v4859_v25 = vld [vmem:[%s7081_s2 + $0x2ac] ss:$16 sps:$4 sm:$0xff]   ;;  %v4854_v26 = vld [vmem:[%s7081_s2 + $0x2a0] ss:$16 sps:$4 sm:$0xff]   ;;  %v4857_v27 = vld [vmem:[%s7081_s2 + $0x2a8] ss:$16 sps:$4 sm:$0xff]  }
  0x1f   :  { %1267 = vmatpush1.bf16.msra.mxu0 %v4774_v30  ;;  %1431 = vmatpush1.bf16.msra.mxu1 %v4775_v31  ;;  %v4862_v28 = vld [vmem:[%s7081_s2 + $0x2c4] ss:$16 sps:$4 sm:$0xff]   ;;  %v4865_v29 = vld [vmem:[%s7081_s2 + $0x2cc] ss:$16 sps:$4 sm:$0xff]   ;;  %v4860_v31 = vld [vmem:[%s7081_s2 + $0x2c0] ss:$16 sps:$4 sm:$0xff]  }
  0x20   :  { %1268 = vmatprep.subr.bf16.mxu0 %v4776_v32  ;;  %1432 = vmatprep.subr.bf16.mxu1 %v4778_v33  ;;  %v39_v30 = vld [vmem:[%s7082_s0 + $0x18] sm:$0xff]  ;;  %v4886_v46 = vld [vmem:[%s7081_s2 + $0x344] ss:$16 sps:$4 sm:$0xff]   ;;  %v4884_v48 = vld [vmem:[%s7081_s2 + $0x340] ss:$16 sps:$4 sm:$0xff]  }
  0x21   :  { %v46_v32 = vpack.c.bf16 %v39_v30, %v39_v30  ;;  %v4863_v33 = vld [vmem:[%s7081_s2 + $0x2c8] ss:$16 sps:$4 sm:$0xff]   ;;  %v4916_v2 = vld [vmem:[%s7081_s2 + $0x3e4] ss:$16 sps:$4 sm:$0xff]  }
  0x22   :  { %v4952_v30 = vld [vmem:[%s7081_s2 + $0x4a4] ss:$16 sps:$4 sm:$0xff]  }
  0x23   :  { %1269 = vmatpush1.bf16.msra.mxu0 %v4780_v34  ;;  %1433 = vmatpush1.bf16.msra.mxu1 %v4781_v35  ;;  %v4868_v34 = vld [vmem:[%s7081_s2 + $0x2e4] ss:$16 sps:$4 sm:$0xff]   ;;  %v4871_v35 = vld [vmem:[%s7081_s2 + $0x2ec] ss:$16 sps:$4 sm:$0xff]  }
  0x24   :  { %1270 = vmatprep.subr.bf16.mxu0 %v4782_v36  ;;  %1434 = vmatprep.subr.bf16.mxu1 %v4784_v37  ;;  %v4866_v36 = vld [vmem:[%s7081_s2 + $0x2e0] ss:$16 sps:$4 sm:$0xff]   ;;  %v4869_v37 = vld [vmem:[%s7081_s2 + $0x2e8] ss:$16 sps:$4 sm:$0xff]  }
  0x27   :  { %1271 = vmatpush1.bf16.msra.mxu0 %v4786_v38  ;;  %1435 = vmatpush1.bf16.msra.mxu1 %v4787_v39  ;;  %v4874_v38 = vld [vmem:[%s7081_s2 + $0x304] ss:$16 sps:$4 sm:$0xff]   ;;  %v4877_v39 = vld [vmem:[%s7081_s2 + $0x30c] ss:$16 sps:$4 sm:$0xff]  }
  0x28   :  { %1272 = vmatprep.subr.bf16.mxu0 %v4788_v40  ;;  %1436 = vmatprep.subr.bf16.mxu1 %v4790_v41  ;;  %v4872_v40 = vld [vmem:[%s7081_s2 + $0x300] ss:$16 sps:$4 sm:$0xff]   ;;  %v4875_v41 = vld [vmem:[%s7081_s2 + $0x308] ss:$16 sps:$4 sm:$0xff]  }
  0x2b   :  { %1273 = vmatpush1.bf16.msra.mxu0 %v4792_v42  ;;  %1437 = vmatpush1.bf16.msra.mxu1 %v4793_v43  ;;  %v4880_v42 = vld [vmem:[%s7081_s2 + $0x324] ss:$16 sps:$4 sm:$0xff]   ;;  %v4883_v43 = vld [vmem:[%s7081_s2 + $0x32c] ss:$16 sps:$4 sm:$0xff]  }
  0x2c   :  { %1274 = vmatprep.subr.bf16.mxu0 %v4794_v44  ;;  %1438 = vmatprep.subr.bf16.mxu1 %v4796_v45  ;;  %v4878_v44 = vld [vmem:[%s7081_s2 + $0x320] ss:$16 sps:$4 sm:$0xff]   ;;  %v4881_v45 = vld [vmem:[%s7081_s2 + $0x328] ss:$16 sps:$4 sm:$0xff]  }
  0x2f   :  { %1275 = vmatpush1.bf16.msra.mxu0 %v4798_v47  ;;  %1439 = vmatpush1.bf16.msra.mxu1 %v4799_v49  ;;  %v4889_v47 = vld [vmem:[%s7081_s2 + $0x34c] ss:$16 sps:$4 sm:$0xff]   ;;  %v4887_v49 = vld [vmem:[%s7081_s2 + $0x348] ss:$16 sps:$4 sm:$0xff]  }
  0x30   :  { %1276 = vmatprep.subr.bf16.mxu0 %v4800_v50  ;;  %1440 = vmatprep.subr.bf16.mxu1 %v4802_v51  ;;  %v4892_v50 = vld [vmem:[%s7081_s2 + $0x364] ss:$16 sps:$4 sm:$0xff]   ;;  %v4895_v51 = vld [vmem:[%s7081_s2 + $0x36c] ss:$16 sps:$4 sm:$0xff]  }
  0x33   :  { %1277 = vmatpush1.bf16.msra.mxu0 %v4804_v52  ;;  %1441 = vmatpush1.bf16.msra.mxu1 %v4805_v53  ;;  %v4890_v52 = vld [vmem:[%s7081_s2 + $0x360] ss:$16 sps:$4 sm:$0xff]   ;;  %v4893_v53 = vld [vmem:[%s7081_s2 + $0x368] ss:$16 sps:$4 sm:$0xff]  }
  0x34   :  { %1278 = vmatprep.subr.bf16.mxu0 %v4806_v54  ;;  %1442 = vmatprep.subr.bf16.mxu1 %v4808_v55  ;;  %v4898_v54 = vld [vmem:[%s7081_s2 + $0x384] ss:$16 sps:$4 sm:$0xff]   ;;  %v4901_v55 = vld [vmem:[%s7081_s2 + $0x38c] ss:$16 sps:$4 sm:$0xff]  }
  0x37   :  { %1279 = vmatpush1.bf16.msra.mxu0 %v4810_v56  ;;  %1443 = vmatpush1.bf16.msra.mxu1 %v4811_v57  ;;  %v4896_v56 = vld [vmem:[%s7081_s2 + $0x380] ss:$16 sps:$4 sm:$0xff]   ;;  %v4899_v57 = vld [vmem:[%s7081_s2 + $0x388] ss:$16 sps:$4 sm:$0xff]  }
  0x38   :  { %1280 = vmatprep.subr.bf16.mxu0 %v4812_v58  ;;  %1444 = vmatprep.subr.bf16.mxu1 %v4814_v59  ;;  %v4904_v58 = vld [vmem:[%s7081_s2 + $0x3a4] ss:$16 sps:$4 sm:$0xff]   ;;  %v4907_v59 = vld [vmem:[%s7081_s2 + $0x3ac] ss:$16 sps:$4 sm:$0xff]  }
  0x3b   :  { %1281 = vmatpush1.bf16.msra.mxu0 %v4816_v60  ;;  %1445 = vmatpush1.bf16.msra.mxu1 %v4817_v61  ;;  %v4902_v60 = vld [vmem:[%s7081_s2 + $0x3a0] ss:$16 sps:$4 sm:$0xff]   ;;  %v4905_v61 = vld [vmem:[%s7081_s2 + $0x3a8] ss:$16 sps:$4 sm:$0xff]  }
  0x3c   :  { %1282 = vmatprep.subr.bf16.mxu0 %v4818_v62  ;;  %1446 = vmatprep.subr.bf16.mxu1 %v4820_v63  ;;  %v4910_v62 = vld [vmem:[%s7081_s2 + $0x3c4] ss:$16 sps:$4 sm:$0xff]   ;;  %v4913_v63 = vld [vmem:[%s7081_s2 + $0x3cc] ss:$16 sps:$4 sm:$0xff]  }
  0x3f   :  { %1283 = vmatpush1.bf16.msra.mxu0 %v4822_v0  ;;  %1447 = vmatpush1.bf16.msra.mxu1 %v4823_v1  ;;  %v4908_v0 = vld [vmem:[%s7081_s2 + $0x3c0] ss:$16 sps:$4 sm:$0xff]   ;;  %v4911_v1 = vld [vmem:[%s7081_s2 + $0x3c8] ss:$16 sps:$4 sm:$0xff]  }
  0x40   :  { %1293 = vmatprep.subr.bf16.mxu0 %v4826_v3  ;;  %1457 = vmatprep.subr.bf16.mxu1 %v4829_v4  ;;  %v4919_v3 = vld [vmem:[%s7081_s2 + $0x3ec] ss:$16 sps:$4 sm:$0xff]   ;;  %v4914_v4 = vld [vmem:[%s7081_s2 + $0x3e0] ss:$16 sps:$4 sm:$0xff]  }
  0x42   :  { %1285 = vmatmul.mubr.bf16.vlgmr.msra.gmra.mrb[0].mxu0 %v43_v5  ;;  %1449 = vmatmul.mubr.bf16.vlgmr.msra.gmra.mrb[0].mxu1 %v43_v5  ;;  %v4917_v5 = vld [vmem:[%s7081_s2 + $0x3e8] ss:$16 sps:$4 sm:$0xff]  }
  0x43   :  { %1294 = vmatpush1.bf16.msra.mxu0 %v4824_v6  ;;  %1458 = vmatpush1.bf16.msra.mxu1 %v4827_v7  ;;  %v4922_v6 = vld [vmem:[%s7081_s2 + $0x404] ss:$16 sps:$4 sm:$0xff]  }
  0x44   :  { %1295 = vmatprep.subr.bf16.mxu0 %v4832_v8  ;;  %1459 = vmatprep.subr.bf16.mxu1 %v4835_v9  ;;  %v38_v7 = vld [vmem:[%s7082_s0 + $0x10] sm:$0xff]  ;;  %v4925_v8 = vld [vmem:[%s7081_s2 + $0x40c] ss:$16 sps:$4 sm:$0xff]  }
  0x45   :  { %1325 = vmatprep.mubr.bf16.mxu0 %v46_v32  ;;  %1489 = vmatprep.mubr.bf16.mxu1 %v46_v32  ;;  %v4920_v9 = vld [vmem:[%s7081_s2 + $0x400] ss:$16 sps:$4 sm:$0xff]  }
  0x46   :  { %v4950_v32 = vld [vmem:[%s7081_s2 + $0x4a0] ss:$16 sps:$4 sm:$0xff]  }
  0x47   :  { %1296 = vmatpush1.bf16.msra.mxu0 %v4830_v10  ;;  %1460 = vmatpush1.bf16.msra.mxu1 %v4833_v11  ;;  %v45_v10 = vpack.c.bf16 %v38_v7, %v38_v7  ;;  %v4923_v11 = vld [vmem:[%s7081_s2 + $0x408] ss:$16 sps:$4 sm:$0xff]   ;;  %v5015_v7 = vld [vmem:[%s7081_s2 + $0x5ec] ss:$16 sps:$4 sm:$0xff]  }
  0x48   :  { %1297 = vmatprep.subr.bf16.mxu0 %v4838_v12  ;;  %1461 = vmatprep.subr.bf16.mxu1 %v4841_v13  ;;  %v4928_v12 = vld [vmem:[%s7081_s2 + $0x424] ss:$16 sps:$4 sm:$0xff]   ;;  %v4931_v13 = vld [vmem:[%s7081_s2 + $0x42c] ss:$16 sps:$4 sm:$0xff]  }
  0x4b   :  { %1298 = vmatpush1.bf16.msra.mxu0 %v4836_v14  ;;  %1462 = vmatpush1.bf16.msra.mxu1 %v4839_v15  ;;  %v41_v14 = vld [vmem:[%s7082_s0 + $0x28] sm:$0xff] }
  0x4c   :  { %1299 = vmatprep.subr.bf16.mxu0 %v4844_v16  ;;  %1463 = vmatprep.subr.bf16.mxu1 %v4847_v17  ;;  %v48_v15 = vpack.c.bf16 %v41_v14, %v41_v14  ;;  %v4926_v16 = vld [vmem:[%s7081_s2 + $0x420] ss:$16 sps:$4 sm:$0xff]   ;;  %v4929_v17 = vld [vmem:[%s7081_s2 + $0x428] ss:$16 sps:$4 sm:$0xff]  }
  0x4d   :  { %v5016_v14 = vld [vmem:[%s7081_s2 + $0x600] ss:$16 sps:$4 sm:$0xff]  }
  0x4f   :  { %1300 = vmatpush1.bf16.msra.mxu0 %v4842_v18  ;;  %1464 = vmatpush1.bf16.msra.mxu1 %v4845_v19  ;;  %v4934_v18 = vld [vmem:[%s7081_s2 + $0x444] ss:$16 sps:$4 sm:$0xff]   ;;  %v4937_v19 = vld [vmem:[%s7081_s2 + $0x44c] ss:$16 sps:$4 sm:$0xff]  }
  0x50   :  { %1301 = vmatprep.subr.bf16.mxu0 %v4850_v20  ;;  %1465 = vmatprep.subr.bf16.mxu1 %v4853_v21  ;;  %v4932_v20 = vld [vmem:[%s7081_s2 + $0x440] ss:$16 sps:$4 sm:$0xff]   ;;  %v4935_v21 = vld [vmem:[%s7081_s2 + $0x448] ss:$16 sps:$4 sm:$0xff]  }
  0x53   :  { %1302 = vmatpush1.bf16.msra.mxu0 %v4848_v22  ;;  %1466 = vmatpush1.bf16.msra.mxu1 %v4851_v23  ;;  %v4940_v22 = vld [vmem:[%s7081_s2 + $0x464] ss:$16 sps:$4 sm:$0xff]   ;;  %v4943_v23 = vld [vmem:[%s7081_s2 + $0x46c] ss:$16 sps:$4 sm:$0xff]  }
  0x54   :  { %1303 = vmatprep.subr.bf16.mxu0 %v4856_v24  ;;  %1467 = vmatprep.subr.bf16.mxu1 %v4859_v25  ;;  %v4938_v24 = vld [vmem:[%s7081_s2 + $0x460] ss:$16 sps:$4 sm:$0xff]   ;;  %v4941_v25 = vld [vmem:[%s7081_s2 + $0x468] ss:$16 sps:$4 sm:$0xff]  }
  0x57   :  { %1304 = vmatpush1.bf16.msra.mxu0 %v4854_v26  ;;  %1468 = vmatpush1.bf16.msra.mxu1 %v4857_v27  ;;  %v4946_v26 = vld [vmem:[%s7081_s2 + $0x484] ss:$16 sps:$4 sm:$0xff]   ;;  %v4949_v27 = vld [vmem:[%s7081_s2 + $0x48c] ss:$16 sps:$4 sm:$0xff]  }
  0x58   :  { %1305 = vmatprep.subr.bf16.mxu0 %v4862_v28  ;;  %1469 = vmatprep.subr.bf16.mxu1 %v4865_v29  ;;  %v4944_v28 = vld [vmem:[%s7081_s2 + $0x480] ss:$16 sps:$4 sm:$0xff]   ;;  %v4947_v29 = vld [vmem:[%s7081_s2 + $0x488] ss:$16 sps:$4 sm:$0xff]  }
  0x5b   :  { %1306 = vmatpush1.bf16.msra.mxu0 %v4860_v31  ;;  %1470 = vmatpush1.bf16.msra.mxu1 %v4863_v33  ;;  %v4955_v31 = vld [vmem:[%s7081_s2 + $0x4ac] ss:$16 sps:$4 sm:$0xff]   ;;  %v4953_v33 = vld [vmem:[%s7081_s2 + $0x4a8] ss:$16 sps:$4 sm:$0xff]  }
  0x5c   :  { %1307 = vmatprep.subr.bf16.mxu0 %v4868_v34  ;;  %1471 = vmatprep.subr.bf16.mxu1 %v4871_v35  ;;  %v4958_v34 = vld [vmem:[%s7081_s2 + $0x4c4] ss:$16 sps:$4 sm:$0xff]   ;;  %v4961_v35 = vld [vmem:[%s7081_s2 + $0x4cc] ss:$16 sps:$4 sm:$0xff]  }
  0x5f   :  { %1308 = vmatpush1.bf16.msra.mxu0 %v4866_v36  ;;  %1472 = vmatpush1.bf16.msra.mxu1 %v4869_v37  ;;  %v4956_v36 = vld [vmem:[%s7081_s2 + $0x4c0] ss:$16 sps:$4 sm:$0xff]   ;;  %v4959_v37 = vld [vmem:[%s7081_s2 + $0x4c8] ss:$16 sps:$4 sm:$0xff]  }
  0x60   :  { %1309 = vmatprep.subr.bf16.mxu0 %v4874_v38  ;;  %1473 = vmatprep.subr.bf16.mxu1 %v4877_v39  ;;  %v4964_v38 = vld [vmem:[%s7081_s2 + $0x4e4] ss:$16 sps:$4 sm:$0xff]   ;;  %v4967_v39 = vld [vmem:[%s7081_s2 + $0x4ec] ss:$16 sps:$4 sm:$0xff]  }
  0x63   :  { %1310 = vmatpush1.bf16.msra.mxu0 %v4872_v40  ;;  %1474 = vmatpush1.bf16.msra.mxu1 %v4875_v41  ;;  %v4962_v40 = vld [vmem:[%s7081_s2 + $0x4e0] ss:$16 sps:$4 sm:$0xff]   ;;  %v4965_v41 = vld [vmem:[%s7081_s2 + $0x4e8] ss:$16 sps:$4 sm:$0xff]  }
  0x64   :  { %1311 = vmatprep.subr.bf16.mxu0 %v4880_v42  ;;  %1475 = vmatprep.subr.bf16.mxu1 %v4883_v43  ;;  %v4970_v42 = vld [vmem:[%s7081_s2 + $0x504] ss:$16 sps:$4 sm:$0xff]   ;;  %v4973_v43 = vld [vmem:[%s7081_s2 + $0x50c] ss:$16 sps:$4 sm:$0xff]  }
  0x67   :  { %1312 = vmatpush1.bf16.msra.mxu0 %v4878_v44  ;;  %1476 = vmatpush1.bf16.msra.mxu1 %v4881_v45  ;;  %v4968_v44 = vld [vmem:[%s7081_s2 + $0x500] ss:$16 sps:$4 sm:$0xff]   ;;  %v4971_v45 = vld [vmem:[%s7081_s2 + $0x508] ss:$16 sps:$4 sm:$0xff]  }
  0x68   :  { %1313 = vmatprep.subr.bf16.mxu0 %v4886_v46  ;;  %1477 = vmatprep.subr.bf16.mxu1 %v4889_v47  ;;  %v4976_v46 = vld [vmem:[%s7081_s2 + $0x524] ss:$16 sps:$4 sm:$0xff]   ;;  %v4979_v47 = vld [vmem:[%s7081_s2 + $0x52c] ss:$16 sps:$4 sm:$0xff]  }
  0x6b   :  { %1314 = vmatpush1.bf16.msra.mxu0 %v4884_v48  ;;  %1478 = vmatpush1.bf16.msra.mxu1 %v4887_v49  ;;  %v4974_v48 = vld [vmem:[%s7081_s2 + $0x520] ss:$16 sps:$4 sm:$0xff]   ;;  %v4977_v49 = vld [vmem:[%s7081_s2 + $0x528] ss:$16 sps:$4 sm:$0xff]  }
  0x6c   :  { %1315 = vmatprep.subr.bf16.mxu0 %v4892_v50  ;;  %1479 = vmatprep.subr.bf16.mxu1 %v4895_v51  ;;  %v4982_v50 = vld [vmem:[%s7081_s2 + $0x544] ss:$16 sps:$4 sm:$0xff]   ;;  %v4985_v51 = vld [vmem:[%s7081_s2 + $0x54c] ss:$16 sps:$4 sm:$0xff]  }
  0x6f   :  { %1316 = vmatpush1.bf16.msra.mxu0 %v4890_v52  ;;  %1480 = vmatpush1.bf16.msra.mxu1 %v4893_v53  ;;  %v4980_v52 = vld [vmem:[%s7081_s2 + $0x540] ss:$16 sps:$4 sm:$0xff]   ;;  %v4983_v53 = vld [vmem:[%s7081_s2 + $0x548] ss:$16 sps:$4 sm:$0xff]  }
  0x70   :  { %1317 = vmatprep.subr.bf16.mxu0 %v4898_v54  ;;  %1481 = vmatprep.subr.bf16.mxu1 %v4901_v55  ;;  %v4988_v54 = vld [vmem:[%s7081_s2 + $0x564] ss:$16 sps:$4 sm:$0xff]   ;;  %v4991_v55 = vld [vmem:[%s7081_s2 + $0x56c] ss:$16 sps:$4 sm:$0xff]  }
  0x73   :  { %1318 = vmatpush1.bf16.msra.mxu0 %v4896_v56  ;;  %1482 = vmatpush1.bf16.msra.mxu1 %v4899_v57  ;;  %v4986_v56 = vld [vmem:[%s7081_s2 + $0x560] ss:$16 sps:$4 sm:$0xff]   ;;  %v4989_v57 = vld [vmem:[%s7081_s2 + $0x568] ss:$16 sps:$4 sm:$0xff]  }
  0x74   :  { %1319 = vmatprep.subr.bf16.mxu0 %v4904_v58  ;;  %1483 = vmatprep.subr.bf16.mxu1 %v4907_v59  ;;  %v4994_v58 = vld [vmem:[%s7081_s2 + $0x584] ss:$16 sps:$4 sm:$0xff]   ;;  %v4997_v59 = vld [vmem:[%s7081_s2 + $0x58c] ss:$16 sps:$4 sm:$0xff]  }
  0x77   :  { %1320 = vmatpush1.bf16.msra.mxu0 %v4902_v60  ;;  %1484 = vmatpush1.bf16.msra.mxu1 %v4905_v61  ;;  %v4992_v60 = vld [vmem:[%s7081_s2 + $0x580] ss:$16 sps:$4 sm:$0xff]   ;;  %v4995_v61 = vld [vmem:[%s7081_s2 + $0x588] ss:$16 sps:$4 sm:$0xff]  }
  0x78   :  { %1321 = vmatprep.subr.bf16.mxu0 %v4910_v62  ;;  %1485 = vmatprep.subr.bf16.mxu1 %v4913_v63  ;;  %v5000_v62 = vld [vmem:[%s7081_s2 + $0x5a4] ss:$16 sps:$4 sm:$0xff]   ;;  %v5003_v63 = vld [vmem:[%s7081_s2 + $0x5ac] ss:$16 sps:$4 sm:$0xff]  }
  0x7b   :  { %1322 = vmatpush1.bf16.msra.mxu0 %v4908_v0  ;;  %1486 = vmatpush1.bf16.msra.mxu1 %v4911_v1  ;;  %v4998_v0 = vld [vmem:[%s7081_s2 + $0x5a0] ss:$16 sps:$4 sm:$0xff]   ;;  %v5001_v1 = vld [vmem:[%s7081_s2 + $0x5a8] ss:$16 sps:$4 sm:$0xff]  }
  0x7c   :  { %1323 = vmatprep.subr.bf16.mxu0 %v4916_v2  ;;  %1487 = vmatprep.subr.bf16.mxu1 %v4919_v3  ;;  %v5006_v2 = vld [vmem:[%s7081_s2 + $0x5c4] ss:$16 sps:$4 sm:$0xff]   ;;  %v5009_v3 = vld [vmem:[%s7081_s2 + $0x5cc] ss:$16 sps:$4 sm:$0xff]  }
  0x7f   :  { %1324 = vmatpush1.bf16.msra.mxu0 %v4914_v4  ;;  %1488 = vmatpush1.bf16.msra.mxu1 %v4917_v5  ;;  %v5004_v4 = vld [vmem:[%s7081_s2 + $0x5c0] ss:$16 sps:$4 sm:$0xff]   ;;  %v5007_v5 = vld [vmem:[%s7081_s2 + $0x5c8] ss:$16 sps:$4 sm:$0xff]  }
  0x80   :  { %1334 = vmatprep.subr.bf16.mxu0 %v4922_v6  ;;  %1498 = vmatprep.subr.bf16.mxu1 %v4925_v8  ;;  %v5012_v6 = vld [vmem:[%s7081_s2 + $0x5e4] ss:$16 sps:$4 sm:$0xff]   ;;  %v5010_v8 = vld [vmem:[%s7081_s2 + $0x5e0] ss:$16 sps:$4 sm:$0xff]  }
  0x82   :  { %1326 = vmatmul.mubr.bf16.vlgmr.msra.gmra.mrb[0].mxu0 %v45_v10  ;;  %1490 = vmatmul.mubr.bf16.vlgmr.msra.gmra.mrb[0].mxu1 %v45_v10  ;;  %v40_v10 = vld [vmem:[%s7082_s0 + $0x20] sm:$0xff] }
  0x83   :  { %1335 = vmatpush1.bf16.msra.mxu0 %v4920_v9  ;;  %1499 = vmatpush1.bf16.msra.mxu1 %v4923_v11  ;;  %v5013_v9 = vld [vmem:[%s7081_s2 + $0x5e8] ss:$16 sps:$4 sm:$0xff]   ;;  %v5018_v11 = vld [vmem:[%s7081_s2 + $0x604] ss:$16 sps:$4 sm:$0xff]  }
  0x84   :  { %1336 = vmatprep.subr.bf16.mxu0 %v4928_v12  ;;  %1500 = vmatprep.subr.bf16.mxu1 %v4931_v13  ;;  %v5021_v12 = vld [vmem:[%s7081_s2 + $0x60c] ss:$16 sps:$4 sm:$0xff]   ;;  %v47_v13 = vpack.c.bf16 %v40_v10, %v40_v10 }
  0x85   :  { %1366 = vmatprep.mubr.bf16.mxu0 %v48_v15  ;;  %1530 = vmatprep.mubr.bf16.mxu1 %v48_v15  ;;  %v5019_v15 = vld [vmem:[%s7081_s2 + $0x608] ss:$16 sps:$4 sm:$0xff]  }
  0x87   :  { %1337 = vmatpush1.bf16.msra.mxu0 %v4926_v16  ;;  %1501 = vmatpush1.bf16.msra.mxu1 %v4929_v17  ;;  %v5022_v16 = vld [vmem:[%s7083_s4 + $0x40] sm:$0xff]   ;;  %v5450_v17 = vmov 0  }
  0x88   :  { %1338 = vmatprep.subr.bf16.mxu0 %v4934_v18  ;;  %1502 = vmatprep.subr.bf16.mxu1 %v4937_v19  ;;  %v42_v18 = vld [vmem:[%s7082_s0 + $0x30] sm:$0xff] }
  0x89   :  { %v49_v19 = vpack.c.bf16 %v42_v18, %v42_v18 }
  0x8b   :  { %1339 = vmatpush1.bf16.msra.mxu0 %v4932_v20  ;;  %1503 = vmatpush1.bf16.msra.mxu1 %v4935_v21  ;;  %v5023_v20 = vld [vmem:[%s7083_s4] sm:$0xff]   ;;  %v5024_v21 = vld [vmem:[%s7083_s4 + $0x48] sm:$0xff]  }
  0x8c   :  { %1340 = vmatprep.subr.bf16.mxu0 %v4940_v22  ;;  %1504 = vmatprep.subr.bf16.mxu1 %v4943_v23  ;;  %v5025_v22 = vld [vmem:[%s7083_s4 + $0x8] sm:$0xff]   ;;  %v5026_v23 = vld [vmem:[%s7083_s4 + $0x50] sm:$0xff]  }
  0x8f   :  { %1341 = vmatpush1.bf16.msra.mxu0 %v4938_v24  ;;  %1505 = vmatpush1.bf16.msra.mxu1 %v4941_v25  ;;  %v5027_v24 = vld [vmem:[%s7083_s4 + $0x10] sm:$0xff]   ;;  %v5028_v25 = vld [vmem:[%s7083_s4 + $0x58] sm:$0xff]  }
  0x90   :  { %1342 = vmatprep.subr.bf16.mxu0 %v4946_v26  ;;  %1506 = vmatprep.subr.bf16.mxu1 %v4949_v27  ;;  %v5029_v26 = vld [vmem:[%s7083_s4 + $0x18] sm:$0xff]   ;;  %v5030_v27 = vld [vmem:[%s7083_s4 + $0x60] sm:$0xff]  }
  0x93   :  { %1343 = vmatpush1.bf16.msra.mxu0 %v4944_v28  ;;  %1507 = vmatpush1.bf16.msra.mxu1 %v4947_v29  ;;  %v5031_v28 = vld [vmem:[%s7083_s4 + $0x20] sm:$0xff]   ;;  %v5032_v29 = vld [vmem:[%s7083_s4 + $0x68] sm:$0xff]  }
  0x94   :  { %1344 = vmatprep.subr.bf16.mxu0 %v4952_v30  ;;  %1508 = vmatprep.subr.bf16.mxu1 %v4955_v31  ;;  %v5033_v30 = vld [vmem:[%s7083_s4 + $0x28] sm:$0xff]   ;;  %v5034_v31 = vld [vmem:[%s7083_s4 + $0x70] sm:$0xff]  }
  0x97   :  { %1345 = vmatpush1.bf16.msra.mxu0 %v4950_v32  ;;  %1509 = vmatpush1.bf16.msra.mxu1 %v4953_v33  ;;  %v5035_v32 = vld [vmem:[%s7083_s4 + $0x30] sm:$0xff]   ;;  %v5036_v33 = vld [vmem:[%s7083_s4 + $0x78] sm:$0xff]  }
  0x98   :  { %1346 = vmatprep.subr.bf16.mxu0 %v4958_v34  ;;  %1510 = vmatprep.subr.bf16.mxu1 %v4961_v35  ;;  %v5037_v34 = vld [vmem:[%s7083_s4 + $0x38] sm:$0xff]   ;;  %v5038_v35 = vld [vmem:[%s7083_s4 + $0xc0] sm:$0xff]  }
  0x9b   :  { %1347 = vmatpush1.bf16.msra.mxu0 %v4956_v36  ;;  %1511 = vmatpush1.bf16.msra.mxu1 %v4959_v37  ;;  %v248_v36 = vlaneseq }
  0x9c   :  { %1348 = vmatprep.subr.bf16.mxu0 %v4964_v38  ;;  %1512 = vmatprep.subr.bf16.mxu1 %v4967_v39  ;;  %v246_v39 = vld [vmem:[%s7084_s3] sm:$0xf] }
  0x9d   :  { %v6169_v37 = vshrl.u32 %v248_v36, 7  ;;  %v5078_v36 = vld [vmem:[%s7085_s6 + $0x80] ss:$16 sps:$4 sm:$0xff]  }
  0x9f   :  { %1349 = vmatpush1.bf16.msra.mxu0 %v4962_v40  ;;  %1513 = vmatpush1.bf16.msra.mxu1 %v4965_v41  ;;  %v6172_v38 = vsub.s32 0, %v6169_v37  ;;  %v6178_v40 = vsub.s32 1, %v6169_v37  ;;  %v6181_v41 = vsub.s32 3, %v6169_v37 }
  0xa0   :  { %1350 = vmatprep.subr.bf16.mxu0 %v4970_v42  ;;  %1514 = vmatprep.subr.bf16.mxu1 %v4973_v43 }
  0xa1   :  { %v251_v42 = vrot.slane %v246_v39, %v6172_v38  ;;  %v255_v43 = vrot.slane %v246_v39, %v6178_v40 }
  0xa3   :  { %1351 = vmatpush1.bf16.msra.mxu0 %v4968_v44  ;;  %1515 = vmatpush1.bf16.msra.mxu1 %v4971_v45  ;;  %v263_v44 = vrot.slane %v246_v39, %v6181_v41 }
  0xa4   :  { %1352 = vmatprep.subr.bf16.mxu0 %v4976_v46  ;;  %1516 = vmatprep.subr.bf16.mxu1 %v4979_v47 }
  0xa7   :  { %1353 = vmatpush1.bf16.msra.mxu0 %v4974_v48  ;;  %1517 = vmatpush1.bf16.msra.mxu1 %v4977_v49 }
  0xa8   :  { %1354 = vmatprep.subr.bf16.mxu0 %v4982_v50  ;;  %1518 = vmatprep.subr.bf16.mxu1 %v4985_v51 }
  0xab   :  { %1355 = vmatpush1.bf16.msra.mxu0 %v4980_v52  ;;  %1519 = vmatpush1.bf16.msra.mxu1 %v4983_v53 }
  0xac   :  { %1356 = vmatprep.subr.bf16.mxu0 %v4988_v54  ;;  %1520 = vmatprep.subr.bf16.mxu1 %v4991_v55 }
  0xaf   :  { %1357 = vmatpush1.bf16.msra.mxu0 %v4986_v56  ;;  %1521 = vmatpush1.bf16.msra.mxu1 %v4989_v57 }
  0xb0   :  { %1358 = vmatprep.subr.bf16.mxu0 %v4994_v58  ;;  %1522 = vmatprep.subr.bf16.mxu1 %v4997_v59 }
  0xb3   :  { %1359 = vmatpush1.bf16.msra.mxu0 %v4992_v60  ;;  %1523 = vmatpush1.bf16.msra.mxu1 %v4995_v61  ;;  %v5039_v60 = vld [vmem:[%s7083_s4 + $0x80] sm:$0xff]  }
  0xb4   :  { %1360 = vmatprep.subr.bf16.mxu0 %v5000_v62  ;;  %1524 = vmatprep.subr.bf16.mxu1 %v5003_v63  ;;  %v5040_v62 = vld [vmem:[%s7083_s4 + $0xc8] sm:$0xff]  }
  0xb7   :  { %1361 = vmatpush1.bf16.msra.mxu0 %v4998_v0  ;;  %1525 = vmatpush1.bf16.msra.mxu1 %v5001_v1  ;;  %v5041_v0 = vld [vmem:[%s7083_s4 + $0x88] sm:$0xff]   ;;  %v5042_v1 = vld [vmem:[%s7083_s4 + $0xd0] sm:$0xff]  }
  0xb8   :  { %1362 = vmatprep.subr.bf16.mxu0 %v5006_v2  ;;  %1526 = vmatprep.subr.bf16.mxu1 %v5009_v3  ;;  %v5043_v2 = vld [vmem:[%s7083_s4 + $0x90] sm:$0xff]   ;;  %v5044_v3 = vld [vmem:[%s7083_s4 + $0xd8] sm:$0xff]  }
  0xbb   :  { %1363 = vmatpush1.bf16.msra.mxu0 %v5004_v4  ;;  %1527 = vmatpush1.bf16.msra.mxu1 %v5007_v5  ;;  %v5045_v4 = vld [vmem:[%s7083_s4 + $0x98] sm:$0xff]   ;;  %v5046_v5 = vld [vmem:[%s7083_s4 + $0xe0] sm:$0xff]  }
  0xbc   :  { %1364 = vmatprep.subr.bf16.mxu0 %v5012_v6  ;;  %1528 = vmatprep.subr.bf16.mxu1 %v5015_v7  ;;  %v5047_v6 = vld [vmem:[%s7083_s4 + $0xa0] sm:$0xff]   ;;  %v6214_v7 = vsub.s32 2, %v6169_v37 }
  0xbe   :  { %v259_v10 = vrot.slane %v246_v39, %v6214_v7  ;;  %v5081_v39 = vld [vmem:[%s7085_s6 + $0x88] ss:$16 sps:$4 sm:$0xff]  }
  0xbf   :  { %1365 = vmatpush1.bf16.msra.mxu0 %v5010_v8  ;;  %1529 = vmatpush1.bf16.msra.mxu1 %v5013_v9  ;;  %v5048_v8 = vld [vmem:[%s7083_s4 + $0xe8] sm:$0xff]  }
  0xc0   :  { %1375 = vmatprep.subr.bf16.mxu0 %v5018_v11  ;;  %1539 = vmatprep.subr.bf16.mxu1 %v5021_v12  ;;  %v5049_v9 = vld [vmem:[%s7083_s4 + $0xa8] sm:$0xff]   ;;  %v5050_v11 = vld [vmem:[%s7083_s4 + $0xf0] sm:$0xff]  }
  0xc1   :  { %v5051_v12 = vld [vmem:[%s7083_s4 + $0xb0] sm:$0xff]  }
  0xc2   :  { %1367 = vmatmul.mubr.bf16.vlgmr.msra.gmra.mrb[0].mxu0 %v47_v13  ;;  %1531 = vmatmul.mubr.bf16.vlgmr.msra.gmra.mrb[0].mxu1 %v47_v13 }
  0xc3   :  { %1376 = vmatpush1.bf16.msra.mxu0 %v5016_v14  ;;  %1540 = vmatpush1.bf16.msra.mxu1 %v5019_v15  ;;  %v5052_v14 = vld [vmem:[%s7083_s4 + $0xf8] sm:$0xff]  }
  0xc4   :  { %1407 = vmatprep.mubr.bf16.mxu0 %v5450_v17  ;;  %1571 = vmatprep.mubr.bf16.mxu1 %v5450_v17  ;;  %v5053_v15 = vld [vmem:[%s7083_s4 + $0xb8] sm:$0xff]  }
  0xc5   :  { %4593 = vmatprep.subr.bf16.mxu1 %v5022_v16 }
  0xce   :  { %4287 = vmatmul.mubr.msk.bf16.vlgmr.msra.gmra.mrb[0].mxu0 %vm1248_vm0, %v49_v19  ;;  %4288 = vmatmul.mubr.msk.bf16.vlgmr.msra.gmra.mrb[0].mxu1 %vm1248_vm0, %v49_v19  ;;  %v5054_v19 = vld [vmem:[%s7085_s6] ss:$16 sps:$4 sm:$0xff]  }
  0xcf   :  { %4594 = vmatpush3.bf16.msra.mxu1 %v5023_v20  ;;  %2182 = vmatprep.mubr.bf16.mxu0 %v5450_v17  ;;  %v5056_v20 = vld [vmem:[%s7085_s6 + $0x4] ss:$16 sps:$4 sm:$0xff]  }
  0xd0   :  { %4595 = vmatprep.subr.bf16.mxu1 %v5024_v21  ;;  %v5057_v21 = vld [vmem:[%s7085_s6 + $0x8] ss:$16 sps:$4 sm:$0xff]   ;;  %2150 = vmatprep.subr.bf16.mxu0 %v5056_v20  ;;  %v5114_v20 = vld [vmem:[%s7086_s8 + $0x70] ss:$28 sps:$4 sm:$0xff]  }
  0xd1   :  { %2151 = vmatpush1.bf16.msra.mxu0 %v5054_v19  ;;  %v5119_v19 = vld [vmem:[%s7086_s8 + $0x7c] ss:$28 sps:$4 sm:$0xff]  }
  0xd3   :  { %4596 = vmatpush3.bf16.msra.mxu1 %v5025_v22  ;;  %v5059_v22 = vld [vmem:[%s7085_s6 + $0xc] ss:$16 sps:$4 sm:$0xff]  }
  0xd4   :  { %4597 = vmatprep.subr.bf16.mxu1 %v5026_v23  ;;  %v5062_v23 = vld [vmem:[%s7085_s6 + $0x24] ss:$16 sps:$4 sm:$0xff]  }
  0xd5   :  { %2152 = vmatprep.subr.bf16.mxu0 %v5062_v23  ;;  %v5120_v23 = vld [vmem:[%s7086_s8 + $0xa8] ss:$28 sps:$4 sm:$0xff]  }
  0xd7   :  { %4598 = vmatpush3.bf16.msra.mxu1 %v5027_v24  ;;  %v5063_v24 = vld [vmem:[%s7085_s6 + $0x28] ss:$16 sps:$4 sm:$0xff]  }
  0xd8   :  { %4599 = vmatprep.subr.bf16.mxu1 %v5028_v25  ;;  %v5065_v25 = vld [vmem:[%s7085_s6 + $0x2c] ss:$16 sps:$4 sm:$0xff]  }
  0xdb   :  { %4600 = vmatpush3.bf16.msra.mxu1 %v5029_v26  ;;  %v5068_v26 = vld [vmem:[%s7085_s6 + $0x44] ss:$16 sps:$4 sm:$0xff]  }
  0xdc   :  { %4601 = vmatprep.subr.bf16.mxu1 %v5030_v27  ;;  %v5066_v27 = vld [vmem:[%s7085_s6 + $0x40] ss:$16 sps:$4 sm:$0xff]  }
  0xdf   :  { %4602 = vmatpush3.bf16.msra.mxu1 %v5031_v28  ;;  %v5071_v28 = vld [vmem:[%s7085_s6 + $0x4c] ss:$16 sps:$4 sm:$0xff]  }
  0xe0   :  { %4603 = vmatprep.subr.bf16.mxu1 %v5032_v29  ;;  %v5069_v29 = vld [vmem:[%s7085_s6 + $0x48] ss:$16 sps:$4 sm:$0xff]  }
  0xe3   :  { %4604 = vmatpush3.bf16.msra.mxu1 %v5033_v30  ;;  %v5074_v30 = vld [vmem:[%s7085_s6 + $0x64] ss:$16 sps:$4 sm:$0xff]  }
  0xe4   :  { %4605 = vmatprep.subr.bf16.mxu1 %v5034_v31  ;;  %v5077_v31 = vld [vmem:[%s7085_s6 + $0x6c] ss:$16 sps:$4 sm:$0xff]  }
  0xe7   :  { %4606 = vmatpush3.bf16.msra.mxu1 %v5035_v32  ;;  %v5072_v32 = vld [vmem:[%s7085_s6 + $0x60] ss:$16 sps:$4 sm:$0xff]  }
  0xe8   :  { %4607 = vmatprep.subr.bf16.mxu1 %v5036_v33  ;;  %v5075_v33 = vld [vmem:[%s7085_s6 + $0x68] ss:$16 sps:$4 sm:$0xff]  }
  0xeb   :  { %4608 = vmatpush3.bf16.msra.mxu1 %v5037_v34  ;;  %v5080_v34 = vld [vmem:[%s7085_s6 + $0x84] ss:$16 sps:$4 sm:$0xff]  }
  0xec   :  { %4615 = vmatprep.subr.bf16.mxu1 %v5038_v35  ;;  %v5083_v35 = vld [vmem:[%s7085_s6 + $0x8c] ss:$16 sps:$4 sm:$0xff]  }
 0x1a1   :  { %v1409_v45 = vpop.f32.mrb[0].mxu0  ;;  %v1573_v46 = vpop.f32.mrb[0].mxu1 }
 0x1a2   :  { %v4681_v47 = vadd.f32 %v1409_v45, %v251_v42  ;;  %v1411_v48 = vpop.f32.mrb[1].mxu0  ;;  %v1575_v49 = vpop.f32.mrb[1].mxu1  ;;  %v4683_v13 = vadd.f32 %v1573_v46, %v259_v10  ;;  %v5086_v42 = vld [vmem:[%s7085_s6 + $0xa4] ss:$16 sps:$4 sm:$0xff]   ;;  %v5087_v45 = vld [vmem:[%s7085_s6 + $0xa8] ss:$16 sps:$4 sm:$0xff]  }
 0x1a3   :  { %v4682_v50 = vadd.f32 %v1411_v48, %v255_v43  ;;  %v4684_v51 = vadd.f32 %v1575_v49, %v263_v44  ;;  %v1413_v52 = vpop.f32.mrb[2].mxu0  ;;  %v1577_v53 = vpop.f32.mrb[2].mxu1  ;;  %v5089_v43 = vld [vmem:[%s7085_s6 + $0xac] ss:$16 sps:$4 sm:$0xff]   ;;  %v5084_v44 = vld [vmem:[%s7085_s6 + $0xa0] ss:$16 sps:$4 sm:$0xff]  }
 0x1a4   :  { %v1580_v54 = vmax.f32 %v4681_v47, 0.0  ;;  %v1414_v55 = vpop.f32.mrb[3].mxu0  ;;  %v1578_v56 = vpop.f32.mrb[3].mxu1  ;;  %v1582_v16 = vmax.f32 %v4683_v13, 0.0  ;;  %v5092_v46 = vld [vmem:[%s7085_s6 + $0xc4] ss:$16 sps:$4 sm:$0xff]  }
 0x1a5   :  { %v1581_v57 = vmax.f32 %v4682_v50, 0.0  ;;  %v1583_v58 = vmax.f32 %v4684_v51, 0.0  ;;  %v5095_v47 = vld [vmem:[%s7085_s6 + $0xcc] ss:$16 sps:$4 sm:$0xff]   ;;  %v5090_v48 = vld [vmem:[%s7085_s6 + $0xc0] ss:$16 sps:$4 sm:$0xff]  }
 0x1a6   :  { %v1584_v61 = vpack.c.bf16 %v1580_v54, %v1580_v54  ;;  %v1586_v18 = vpack.c.bf16 %v1582_v16, %v1582_v16  ;;  %v5093_v49 = vld [vmem:[%s7085_s6 + $0xc8] ss:$16 sps:$4 sm:$0xff]   ;;  %v5098_v50 = vld [vmem:[%s7085_s6 + $0xe4] ss:$16 sps:$4 sm:$0xff]   ;;  %v5101_v51 = vld [vmem:[%s7085_s6 + $0xec] ss:$16 sps:$4 sm:$0xff]  }
 0x1a7   :  { %v1585_v59 = vpack.c.bf16 %v1581_v57, %v1581_v57  ;;  %v1587_v63 = vpack.c.bf16 %v1583_v58, %v1583_v58  ;;  %v5096_v52 = vld [vmem:[%s7085_s6 + $0xe0] ss:$16 sps:$4 sm:$0xff]   ;;  %v5099_v53 = vld [vmem:[%s7085_s6 + $0xe8] ss:$16 sps:$4 sm:$0xff]  }
 0x1a8   :  { %v5104_v54 = vld [vmem:[%s7086_s8 + $0x4] ss:$28 sps:$4 sm:$0xff]   ;;  %v5107_v55 = vld [vmem:[%s7086_s8 + $0xc] ss:$28 sps:$4 sm:$0xff]   ;;  %v5110_v13 = vld [vmem:[%s7086_s8 + $0x3c] ss:$28 sps:$4 sm:$0xff]  }
 0x1a9   :  { %1883 = vmatprep.mubr.bf16.mxu1 %v1585_v59  ;;  %v5102_v10 = vld [vmem:[%s7086_s8] ss:$28 sps:$4 sm:$0xff]  }
 0x1aa   :  { %1884 = vmatmul.mubr.bf16.vlgmr.msra.gmra.mrb[4].mxu1 %v1584_v61  ;;  %v4289_v61 = vld [vmem:[%s7087_s5] ss:$0 sm:$0xff] }
 0x1ab   :  { %4616 = vmatpush3.bf16.msra.mxu1 %v5039_v60  ;;  %1923 = vmatprep.mubr.bf16.mxu1 %v1587_v63  ;;  %v5111_v16 = vld [vmem:[%s7086_s8 + $0x40] ss:$28 sps:$4 sm:$0xff]  }
 0x1ac   :  { %4617 = vmatprep.subr.bf16.mxu1 %v5040_v62  ;;  %v1931_v62 = vld [vmem:[%s7088_s1] sm:$0xf] }
 0x1af   :  { %4618 = vmatpush3.bf16.msra.mxu1 %v5041_v0 }
 0x1b0   :  { %4619 = vmatprep.subr.bf16.mxu1 %v5042_v1 }
 0x1b3   :  { %4620 = vmatpush3.bf16.msra.mxu1 %v5043_v2 }
 0x1b4   :  { %4621 = vmatprep.subr.bf16.mxu1 %v5044_v3  ;;  %v1932_v3 = vunpack.c.l.bf16 %v1931_v62  ;;  %v5179_v62 = vld [vmem:[%s7086_s8 + $0x2ac] ss:$28 sps:$4 sm:$0xff]  }
 0x1b7   :  { %4622 = vmatpush3.bf16.msra.mxu1 %v5045_v4 }
 0x1b8   :  { %4623 = vmatprep.subr.bf16.mxu1 %v5046_v5 }
 0x1bb   :  { %4624 = vmatpush3.bf16.msra.mxu1 %v5047_v6 }
 0x1bc   :  { %4625 = vmatprep.subr.bf16.mxu1 %v5048_v8 }
 0x1bf   :  { %4626 = vmatpush3.bf16.msra.mxu1 %v5049_v9 }
 0x1c0   :  { %4627 = vmatprep.subr.bf16.mxu1 %v5050_v11  ;;  %v5105_v11 = vld [vmem:[%s7086_s8 + $0x8] ss:$28 sps:$4 sm:$0xff]  }
 0x1c3   :  { %4628 = vmatpush3.bf16.msra.mxu1 %v5051_v12 }
 0x1c4   :  { %4629 = vmatprep.subr.bf16.mxu1 %v5052_v14  ;;  %v5113_v14 = vld [vmem:[%s7086_s8 + $0x44] ss:$28 sps:$4 sm:$0xff]  }
 0x1c7   :  { %4630 = vmatpush3.bf16.msra.mxu1 %v5053_v15  ;;  %v5108_v15 = vld [vmem:[%s7086_s8 + $0x38] ss:$28 sps:$4 sm:$0xff]  }
 0x1c8   :  { %2191 = vmatprep.subr.bf16.mxu1 %v5059_v22  ;;  %v5122_v22 = vld [vmem:[%s7086_s8 + $0xac] ss:$28 sps:$4 sm:$0xff]  }
 0x1ca   :  { %1924 = vmatmul.mubr.bf16.vlgmr.msra.gmra.mrb[8].mxu1 %v1586_v18  ;;  %v5116_v18 = vld [vmem:[%s7086_s8 + $0x74] ss:$28 sps:$4 sm:$0xff]  }
 0x1cb   :  { %2223 = vmatprep.mubr.bf16.mxu1 %v5450_v17  ;;  %v5060_v17 = vld [vmem:[%s7085_s6 + $0x20] ss:$16 sps:$4 sm:$0xff]   ;;  %2192 = vmatpush1.bf16.msra.mxu1 %v5057_v21  ;;  %v5117_v21 = vld [vmem:[%s7086_s8 + $0x78] ss:$28 sps:$4 sm:$0xff]  }
 0x1cc   :  { %2193 = vmatprep.subr.bf16.mxu1 %v5065_v25  ;;  %2153 = vmatpush1.bf16.msra.mxu0 %v5060_v17  ;;  %v5125_v17 = vld [vmem:[%s7086_s8 + $0xb4] ss:$28 sps:$4 sm:$0xff]   ;;  %v5128_v25 = vld [vmem:[%s7086_s8 + $0xe4] ss:$28 sps:$4 sm:$0xff]  }
 0x1cd   :  { %2154 = vmatprep.subr.bf16.mxu0 %v5068_v26  ;;  %v5131_v26 = vld [vmem:[%s7086_s8 + $0xec] ss:$28 sps:$4 sm:$0xff]  }
 0x1cf   :  { %2194 = vmatpush1.bf16.msra.mxu1 %v5063_v24  ;;  %v5123_v24 = vld [vmem:[%s7086_s8 + $0xb0] ss:$28 sps:$4 sm:$0xff]  }
 0x1d0   :  { %2195 = vmatprep.subr.bf16.mxu1 %v5071_v28  ;;  %2155 = vmatpush1.bf16.msra.mxu0 %v5066_v27  ;;  %v5126_v27 = vld [vmem:[%s7086_s8 + $0xe0] ss:$28 sps:$4 sm:$0xff]   ;;  %v5129_v28 = vld [vmem:[%s7086_s8 + $0xe8] ss:$28 sps:$4 sm:$0xff]  }
 0x1d1   :  { %2156 = vmatprep.subr.bf16.mxu0 %v5074_v30  ;;  %v5137_v30 = vld [vmem:[%s7086_s8 + $0x124] ss:$28 sps:$4 sm:$0xff]  }
 0x1d3   :  { %2196 = vmatpush1.bf16.msra.mxu1 %v5069_v29  ;;  %v5134_v29 = vld [vmem:[%s7086_s8 + $0x11c] ss:$28 sps:$4 sm:$0xff]  }
 0x1d4   :  { %2197 = vmatprep.subr.bf16.mxu1 %v5077_v31  ;;  %2157 = vmatpush1.bf16.msra.mxu0 %v5072_v32  ;;  %v5132_v31 = vld [vmem:[%s7086_s8 + $0x118] ss:$28 sps:$4 sm:$0xff]   ;;  %v5135_v32 = vld [vmem:[%s7086_s8 + $0x120] ss:$28 sps:$4 sm:$0xff]  }
 0x1d5   :  { %2158 = vmatprep.subr.bf16.mxu0 %v5080_v34  ;;  %v5143_v34 = vld [vmem:[%s7086_s8 + $0x15c] ss:$28 sps:$4 sm:$0xff]  }
 0x1d7   :  { %2198 = vmatpush1.bf16.msra.mxu1 %v5075_v33  ;;  %v5140_v33 = vld [vmem:[%s7086_s8 + $0x154] ss:$28 sps:$4 sm:$0xff]  }
 0x1d8   :  { %2199 = vmatprep.subr.bf16.mxu1 %v5083_v35  ;;  %2159 = vmatpush1.bf16.msra.mxu0 %v5078_v36  ;;  %v5138_v35 = vld [vmem:[%s7086_s8 + $0x150] ss:$28 sps:$4 sm:$0xff]   ;;  %v5141_v36 = vld [vmem:[%s7086_s8 + $0x158] ss:$28 sps:$4 sm:$0xff]  }
 0x1d9   :  { %2160 = vmatprep.subr.bf16.mxu0 %v5086_v42  ;;  %v5149_v42 = vld [vmem:[%s7086_s8 + $0x194] ss:$28 sps:$4 sm:$0xff]  }
 0x1db   :  { %2200 = vmatpush1.bf16.msra.mxu1 %v5081_v39  ;;  %v5146_v39 = vld [vmem:[%s7086_s8 + $0x18c] ss:$28 sps:$4 sm:$0xff]  }
 0x1dc   :  { %2201 = vmatprep.subr.bf16.mxu1 %v5089_v43  ;;  %2161 = vmatpush1.bf16.msra.mxu0 %v5084_v44  ;;  %v5144_v43 = vld [vmem:[%s7086_s8 + $0x188] ss:$28 sps:$4 sm:$0xff]   ;;  %v5147_v44 = vld [vmem:[%s7086_s8 + $0x190] ss:$28 sps:$4 sm:$0xff]  }
 0x1dd   :  { %2162 = vmatprep.subr.bf16.mxu0 %v5092_v46  ;;  %v5155_v46 = vld [vmem:[%s7086_s8 + $0x1cc] ss:$28 sps:$4 sm:$0xff]  }
 0x1df   :  { %2202 = vmatpush1.bf16.msra.mxu1 %v5087_v45  ;;  %v5152_v45 = vld [vmem:[%s7086_s8 + $0x1c4] ss:$28 sps:$4 sm:$0xff]  }
 0x1e0   :  { %2203 = vmatprep.subr.bf16.mxu1 %v5095_v47  ;;  %2163 = vmatpush1.bf16.msra.mxu0 %v5090_v48  ;;  %v5150_v47 = vld [vmem:[%s7086_s8 + $0x1c0] ss:$28 sps:$4 sm:$0xff]   ;;  %v5153_v48 = vld [vmem:[%s7086_s8 + $0x1c8] ss:$28 sps:$4 sm:$0xff]  }
 0x1e1   :  { %2164 = vmatprep.subr.bf16.mxu0 %v5098_v50  ;;  %v5161_v50 = vld [vmem:[%s7086_s8 + $0x204] ss:$28 sps:$4 sm:$0xff]  }
 0x1e3   :  { %2204 = vmatpush1.bf16.msra.mxu1 %v5093_v49  ;;  %v5158_v49 = vld [vmem:[%s7086_s8 + $0x1fc] ss:$28 sps:$4 sm:$0xff]  }
 0x1e4   :  { %2205 = vmatprep.subr.bf16.mxu1 %v5101_v51  ;;  %2165 = vmatpush1.bf16.msra.mxu0 %v5096_v52  ;;  %v5156_v51 = vld [vmem:[%s7086_s8 + $0x1f8] ss:$28 sps:$4 sm:$0xff]   ;;  %v5159_v52 = vld [vmem:[%s7086_s8 + $0x200] ss:$28 sps:$4 sm:$0xff]  }
 0x1e5   :  { %3685 = vmatprep.subr.bf16.mxu0 %v5104_v54  ;;  %v5167_v54 = vld [vmem:[%s7086_s8 + $0x23c] ss:$28 sps:$4 sm:$0xff]  }
 0x1e7   :  { %2206 = vmatpush1.bf16.msra.mxu1 %v5099_v53  ;;  %v5164_v53 = vld [vmem:[%s7086_s8 + $0x234] ss:$28 sps:$4 sm:$0xff]  }
 0x1e8   :  { %3767 = vmatprep.subr.bf16.mxu1 %v5107_v55  ;;  %v5162_v55 = vld [vmem:[%s7086_s8 + $0x230] ss:$28 sps:$4 sm:$0xff]  }
 0x27d   :  { %v4609_v56 = vpop.f32.mrb[4].mxu1 }
 0x27e   :  { %v4610_v57 = vpop.f32.mrb[5].mxu1 }
 0x27f   :  { %v4611_v58 = vadd.f32 %v4610_v57, %v4609_v56  ;;  %v4612_v59 = vpop.f32.mrb[6].mxu1  ;;  %v5165_v56 = vld [vmem:[%s7086_s8 + $0x238] ss:$28 sps:$4 sm:$0xff]   ;;  %v5170_v57 = vld [vmem:[%s7086_s8 + $0x26c] ss:$28 sps:$4 sm:$0xff]  }
 0x280   :  { %v4613_v60 = vpop.f32.mrb[7].mxu1  ;;  %v5168_v59 = vld [vmem:[%s7086_s8 + $0x268] ss:$28 sps:$4 sm:$0xff]  }
 0x281   :  { %v1886_v1 = vadd.f32 %v4611_v58, %v4289_v61  ;;  %v5173_v58 = vld [vmem:[%s7086_s8 + $0x274] ss:$28 sps:$4 sm:$0xff]   ;;  %v5176_v61 = vld [vmem:[%s7086_s8 + $0x2a4] ss:$28 sps:$4 sm:$0xff]  }
 0x282   :  { %v5171_v60 = vld [vmem:[%s7086_s8 + $0x270] ss:$28 sps:$4 sm:$0xff]  }
 0x29d   :  { %v4631_v63 = vpop.f32.mrb[8].mxu1 }
 0x29e   :  { %v4632_v0 = vpop.f32.mrb[9].mxu1 }
 0x29f   :  { %v4633_v2 = vadd.f32 %v4632_v0, %v4631_v63  ;;  %v4634_v4 = vpop.f32.mrb[10].mxu1  ;;  %v5174_v63 = vld [vmem:[%s7086_s8 + $0x2a0] ss:$28 sps:$4 sm:$0xff]   ;;  %v5177_v0 = vld [vmem:[%s7086_s8 + $0x2a8] ss:$28 sps:$4 sm:$0xff]  }
 0x2a0   :  { %v4635_v5 = vpop.f32.mrb[11].mxu1  ;;  %v5183_v4 = vld [vmem:[%s7086_s8 + $0x2e0] ss:$28 sps:$4 sm:$0xff]  }
 0x2a1   :  { %v1926_v6 = vadd.f32 %v4633_v2, %v1886_v1  ;;  %v5182_v1 = vld [vmem:[%s7086_s8 + $0x2dc] ss:$28 sps:$4 sm:$0xff]   ;;  %v5185_v2 = vld [vmem:[%s7086_s8 + $0x2e4] ss:$28 sps:$4 sm:$0xff]   ;;  %v5188_v5 = vld [vmem:[%s7086_s8 + $0x314] ss:$28 sps:$4 sm:$0xff]  }
 0x2a3   :  { %v1933_v8 = vmul.f32 %v1932_v3, %v1926_v6  ;;  %v5180_v3 = vld [vmem:[%s7086_s8 + $0x2d8] ss:$28 sps:$4 sm:$0xff]  }
 0x2a5   :  { %v1934_v9 = vadd.f32 %v1933_v8, %v1926_v6  ;;  %v5191_v6 = vld [vmem:[%s7086_s8 + $0x31c] ss:$28 sps:$4 sm:$0xff]   ;;  %v5186_v8 = vld [vmem:[%s7086_s8 + $0x310] ss:$28 sps:$4 sm:$0xff]  }
 0x2a7   :  { %v1935_v12 = vpack.c.bf16 %v1934_v9, %v1934_v9  ;;  %v5189_v9 = vld [vmem:[%s7086_s8 + $0x318] ss:$28 sps:$4 sm:$0xff]  }
 0x2a9   :  { %2183 = vmatmul.mubr.bf16.vlgmr.msra.gmra.mrb[4].mxu0 %v1935_v12  ;;  %2224 = vmatmul.mubr.bf16.vlgmr.msra.gmra.mrb[12].mxu1 %v1935_v12  ;;  %v5192_v12 = vld [vmem:[%s7086_s8 + $0x348] ss:$28 sps:$4 sm:$0xff]  }
 0x2aa   :  { %3686 = vmatpush1.bf16.msra.mxu0 %v5102_v10  ;;  %3768 = vmatpush1.bf16.msra.mxu1 %v5105_v11  ;;  %v5194_v10 = vld [vmem:[%s7086_s8 + $0x34c] ss:$28 sps:$4 sm:$0xff]   ;;  %v5197_v11 = vld [vmem:[%s7086_s8 + $0x354] ss:$28 sps:$4 sm:$0xff]  }
 0x2ab   :  { %3687 = vmatprep.subr.bf16.mxu0 %v5110_v13  ;;  %3769 = vmatprep.subr.bf16.mxu1 %v5113_v14  ;;  %v5195_v13 = vld [vmem:[%s7086_s8 + $0x350] ss:$28 sps:$4 sm:$0xff]   ;;  %v5200_v14 = vld [vmem:[%s7086_s8 + $0x384] ss:$28 sps:$4 sm:$0xff]  }
 0x2ae   :  { %3688 = vmatpush1.bf16.msra.mxu0 %v5108_v15  ;;  %3770 = vmatpush1.bf16.msra.mxu1 %v5111_v16  ;;  %v5203_v15 = vld [vmem:[%s7086_s8 + $0x38c] ss:$28 sps:$4 sm:$0xff]   ;;  %v6539_v16 = vld [vmem:[%s7089_s7] sm:$0xf] }
 0x2af   :  { %3689 = vmatprep.subr.bf16.mxu0 %v5116_v18  ;;  %3771 = vmatprep.subr.bf16.mxu1 %v5119_v19  ;;  %v1973_v18 = vrot.slane %v6539_v16, %v6172_v38  ;;  %v1977_v19 = vrot.slane %v6539_v16, %v6178_v40 }
 0x2b2   :  { %3690 = vmatpush1.bf16.msra.mxu0 %v5114_v20  ;;  %3772 = vmatpush1.bf16.msra.mxu1 %v5117_v21  ;;  %v1985_v20 = vrot.slane %v6539_v16, %v6181_v41 }
 0x2b3   :  { %3691 = vmatprep.subr.bf16.mxu0 %v5122_v22  ;;  %3773 = vmatprep.subr.bf16.mxu1 %v5125_v17 }
 0x2b6   :  { %3692 = vmatpush1.bf16.msra.mxu0 %v5120_v23  ;;  %3774 = vmatpush1.bf16.msra.mxu1 %v5123_v24 }
 0x2b7   :  { %3693 = vmatprep.subr.bf16.mxu0 %v5128_v25  ;;  %3775 = vmatprep.subr.bf16.mxu1 %v5131_v26 }
 0x2ba   :  { %3694 = vmatpush1.bf16.msra.mxu0 %v5126_v27  ;;  %3776 = vmatpush1.bf16.msra.mxu1 %v5129_v28 }
 0x2bb   :  { %3695 = vmatprep.subr.bf16.mxu0 %v5134_v29  ;;  %3777 = vmatprep.subr.bf16.mxu1 %v5137_v30 }
 0x2be   :  { %3696 = vmatpush1.bf16.msra.mxu0 %v5132_v31  ;;  %3778 = vmatpush1.bf16.msra.mxu1 %v5135_v32 }
 0x2bf   :  { %3697 = vmatprep.subr.bf16.mxu0 %v5140_v33  ;;  %3779 = vmatprep.subr.bf16.mxu1 %v5143_v34 }
 0x2c2   :  { %3698 = vmatpush1.bf16.msra.mxu0 %v5138_v35  ;;  %3780 = vmatpush1.bf16.msra.mxu1 %v5141_v36  ;;  %v5198_v35 = vld [vmem:[%s7086_s8 + $0x380] ss:$28 sps:$4 sm:$0xff]   ;;  %v5201_v36 = vld [vmem:[%s7086_s8 + $0x388] ss:$28 sps:$4 sm:$0xff]  }
 0x2c3   :  { %3699 = vmatprep.subr.bf16.mxu0 %v5146_v39  ;;  %3781 = vmatprep.subr.bf16.mxu1 %v5149_v42  ;;  %v5206_v42 = vld [vmem:[%s7086_s8 + $0x3bc] ss:$28 sps:$4 sm:$0xff]  }
 0x2c6   :  { %3700 = vmatpush1.bf16.msra.mxu0 %v5144_v43  ;;  %3782 = vmatpush1.bf16.msra.mxu1 %v5147_v44  ;;  %v5209_v43 = vld [vmem:[%s7086_s8 + $0x3c4] ss:$28 sps:$4 sm:$0xff]  }
 0x2c7   :  { %3701 = vmatprep.subr.bf16.mxu0 %v5152_v45  ;;  %3783 = vmatprep.subr.bf16.mxu1 %v5155_v46  ;;  %v5204_v45 = vld [vmem:[%s7086_s8 + $0x3b8] ss:$28 sps:$4 sm:$0xff]   ;;  %v5207_v46 = vld [vmem:[%s7086_s8 + $0x3c0] ss:$28 sps:$4 sm:$0xff]  }
 0x2ca   :  { %3702 = vmatpush1.bf16.msra.mxu0 %v5150_v47  ;;  %3784 = vmatpush1.bf16.msra.mxu1 %v5153_v48  ;;  %v5212_v47 = vld [vmem:[%s7086_s8 + $0x3f4] ss:$28 sps:$4 sm:$0xff]   ;;  %v5215_v48 = vld [vmem:[%s7086_s8 + $0x3fc] ss:$28 sps:$4 sm:$0xff]  }
 0x2cb   :  { %3703 = vmatprep.subr.bf16.mxu0 %v5158_v49  ;;  %3785 = vmatprep.subr.bf16.mxu1 %v5161_v50  ;;  %v5210_v49 = vld [vmem:[%s7086_s8 + $0x3f0] ss:$28 sps:$4 sm:$0xff]   ;;  %v5213_v50 = vld [vmem:[%s7086_s8 + $0x3f8] ss:$28 sps:$4 sm:$0xff]  }
 0x2ce   :  { %3704 = vmatpush1.bf16.msra.mxu0 %v5156_v51  ;;  %3786 = vmatpush1.bf16.msra.mxu1 %v5159_v52  ;;  %v5218_v51 = vld [vmem:[%s7086_s8 + $0x42c] ss:$28 sps:$4 sm:$0xff]   ;;  %v5221_v52 = vld [vmem:[%s7086_s8 + $0x434] ss:$28 sps:$4 sm:$0xff]  }
 0x2cf   :  { %3705 = vmatprep.subr.bf16.mxu0 %v5164_v53  ;;  %3787 = vmatprep.subr.bf16.mxu1 %v5167_v54  ;;  %v5216_v53 = vld [vmem:[%s7086_s8 + $0x428] ss:$28 sps:$4 sm:$0xff]   ;;  %v5219_v54 = vld [vmem:[%s7086_s8 + $0x430] ss:$28 sps:$4 sm:$0xff]  }
 0x2d2   :  { %3706 = vmatpush1.bf16.msra.mxu0 %v5162_v55  ;;  %3788 = vmatpush1.bf16.msra.mxu1 %v5165_v56  ;;  %v5224_v55 = vld [vmem:[%s7086_s8 + $0x464] ss:$28 sps:$4 sm:$0xff]   ;;  %v5227_v56 = vld [vmem:[%s7086_s8 + $0x46c] ss:$28 sps:$4 sm:$0xff]  }
 0x2d3   :  { %3707 = vmatprep.subr.bf16.mxu0 %v5170_v57  ;;  %3789 = vmatprep.subr.bf16.mxu1 %v5173_v58  ;;  %v5222_v57 = vld [vmem:[%s7086_s8 + $0x460] ss:$28 sps:$4 sm:$0xff]   ;;  %v5225_v58 = vld [vmem:[%s7086_s8 + $0x468] ss:$28 sps:$4 sm:$0xff]  }
 0x2d6   :  { %3708 = vmatpush1.bf16.msra.mxu0 %v5168_v59  ;;  %3790 = vmatpush1.bf16.msra.mxu1 %v5171_v60  ;;  %v5230_v59 = vld [vmem:[%s7086_s8 + $0x49c] ss:$28 sps:$4 sm:$0xff]   ;;  %v5233_v60 = vld [vmem:[%s7086_s8 + $0x4a4] ss:$28 sps:$4 sm:$0xff]  }
 0x2d7   :  { %3709 = vmatprep.subr.bf16.mxu0 %v5176_v61  ;;  %3791 = vmatprep.subr.bf16.mxu1 %v5179_v62  ;;  %v5228_v61 = vld [vmem:[%s7086_s8 + $0x498] ss:$28 sps:$4 sm:$0xff]   ;;  %v5231_v62 = vld [vmem:[%s7086_s8 + $0x4a0] ss:$28 sps:$4 sm:$0xff]  }
 0x2da   :  { %3710 = vmatpush1.bf16.msra.mxu0 %v5174_v63  ;;  %3792 = vmatpush1.bf16.msra.mxu1 %v5177_v0  ;;  %v5236_v63 = vld [vmem:[%s7086_s8 + $0x4d4] ss:$28 sps:$4 sm:$0xff]   ;;  %v5239_v0 = vld [vmem:[%s7086_s8 + $0x4dc] ss:$28 sps:$4 sm:$0xff]  }
 0x2db   :  { %3711 = vmatprep.subr.bf16.mxu0 %v5182_v1  ;;  %3793 = vmatprep.subr.bf16.mxu1 %v5185_v2  ;;  %v5234_v1 = vld [vmem:[%s7086_s8 + $0x4d0] ss:$28 sps:$4 sm:$0xff]   ;;  %v5237_v2 = vld [vmem:[%s7086_s8 + $0x4d8] ss:$28 sps:$4 sm:$0xff]  }
 0x2de   :  { %3712 = vmatpush1.bf16.msra.mxu0 %v5180_v3  ;;  %3794 = vmatpush1.bf16.msra.mxu1 %v5183_v4  ;;  %v5242_v3 = vld [vmem:[%s7086_s8 + $0x50c] ss:$28 sps:$4 sm:$0xff]   ;;  %v5245_v4 = vld [vmem:[%s7086_s8 + $0x514] ss:$28 sps:$4 sm:$0xff]  }
 0x2df   :  { %3713 = vmatprep.subr.bf16.mxu0 %v5188_v5  ;;  %3795 = vmatprep.subr.bf16.mxu1 %v5191_v6  ;;  %v5240_v5 = vld [vmem:[%s7086_s8 + $0x508] ss:$28 sps:$4 sm:$0xff]   ;;  %v5243_v6 = vld [vmem:[%s7086_s8 + $0x510] ss:$28 sps:$4 sm:$0xff]  }
 0x2e2   :  { %3714 = vmatpush1.bf16.msra.mxu0 %v5186_v8  ;;  %3796 = vmatpush1.bf16.msra.mxu1 %v5189_v9  ;;  %v5248_v8 = vld [vmem:[%s7086_s8 + $0x544] ss:$28 sps:$4 sm:$0xff]   ;;  %v5251_v9 = vld [vmem:[%s7086_s8 + $0x54c] ss:$28 sps:$4 sm:$0xff]  }
 0x2e3   :  { %3715 = vmatprep.subr.bf16.mxu0 %v5194_v10  ;;  %3797 = vmatprep.subr.bf16.mxu1 %v5197_v11  ;;  %v5246_v10 = vld [vmem:[%s7086_s8 + $0x540] ss:$28 sps:$4 sm:$0xff]   ;;  %v5249_v11 = vld [vmem:[%s7086_s8 + $0x548] ss:$28 sps:$4 sm:$0xff]  }
 0x2e6   :  { %3716 = vmatpush1.bf16.msra.mxu0 %v5192_v12  ;;  %3798 = vmatpush1.bf16.msra.mxu1 %v5195_v13  ;;  %v5254_v12 = vld [vmem:[%s7086_s8 + $0x57c] ss:$28 sps:$4 sm:$0xff]   ;;  %v5257_v13 = vld [vmem:[%s7086_s8 + $0x584] ss:$28 sps:$4 sm:$0xff]  }
 0x2e7   :  { %3726 = vmatprep.subr.bf16.mxu0 %v5200_v14  ;;  %3808 = vmatprep.subr.bf16.mxu1 %v5203_v15  ;;  %v5252_v14 = vld [vmem:[%s7086_s8 + $0x578] ss:$28 sps:$4 sm:$0xff]   ;;  %v5255_v15 = vld [vmem:[%s7086_s8 + $0x580] ss:$28 sps:$4 sm:$0xff]  }
 0x37c   :  { %v2184_v21 = vpop.f32.mrb[4].mxu0  ;;  %v6547_v22 = vpop.f32.mrb[12].mxu1 }
 0x37d   :  { %v2185_v17 = vadd.f32 %v2184_v21, %v1973_v18  ;;  %v2186_v23 = vpop.f32.mrb[5].mxu0  ;;  %v2227_v24 = vpop.f32.mrb[13].mxu1  ;;  %v5260_v18 = vld [vmem:[%s7086_s8 + $0x5b4] ss:$28 sps:$4 sm:$0xff]  }
 0x37e   :  { %v2187_v25 = vadd.f32 %v2186_v23, %v1977_v19  ;;  %v2228_v26 = vadd.f32 %v2227_v24, %v1985_v20  ;;  %v2188_v27 = vpop.f32.mrb[6].mxu0  ;;  %v2229_v28 = vpop.f32.mrb[14].mxu1  ;;  %v5263_v19 = vld [vmem:[%s7086_s8 + $0x5bc] ss:$28 sps:$4 sm:$0xff]   ;;  %v5258_v20 = vld [vmem:[%s7086_s8 + $0x5b0] ss:$28 sps:$4 sm:$0xff]  }
 0x37f   :  { %v2232_v29 = vmax.f32 %v2185_v17, 0.0  ;;  %v2189_v30 = vpop.f32.mrb[7].mxu0  ;;  %v2230_v31 = vpop.f32.mrb[15].mxu1  ;;  %v5261_v21 = vld [vmem:[%s7086_s8 + $0x5b8] ss:$28 sps:$4 sm:$0xff]  }
 0x380   :  { %v2233_v32 = vmax.f32 %v2187_v25, 0.0  ;;  %v2235_v33 = vmax.f32 %v2228_v26, 0.0  ;;  %v5266_v17 = vld [vmem:[%s7086_s8 + $0x5ec] ss:$28 sps:$4 sm:$0xff]   ;;  %v5269_v23 = vld [vmem:[%s7086_s8 + $0x5f4] ss:$28 sps:$4 sm:$0xff]  }
 0x381   :  { %v6557_v39 = vpack.c.bf16 %v2232_v29, %v2232_v29  ;;  %v5264_v24 = vld [vmem:[%s7086_s8 + $0x5e8] ss:$28 sps:$4 sm:$0xff]   ;;  %v5267_v25 = vld [vmem:[%s7086_s8 + $0x5f0] ss:$28 sps:$4 sm:$0xff]   ;;  %v5270_v28 = vld [vmem:[%s7086_s8 + $0x620] ss:$28 sps:$4 sm:$0xff]  }
 0x382   :  { %v6549_v34 = vpack.c.bf16 %v2233_v32, %v2233_v32  ;;  %v6567_v44 = vpack.c.bf16 %v2235_v33, %v2235_v33  ;;  %v5272_v26 = vld [vmem:[%s7086_s8 + $0x624] ss:$28 sps:$4 sm:$0xff]   ;;  %v5275_v27 = vld [vmem:[%s7086_s8 + $0x62c] ss:$28 sps:$4 sm:$0xff]   ;;  %v5278_v30 = vld [vmem:[%s7086_s8 + $0x65c] ss:$28 sps:$4 sm:$0xff]  }
 0x383   :  { %v5273_v29 = vld [vmem:[%s7086_s8 + $0x628] ss:$28 sps:$4 sm:$0xff]   ;;  %v5276_v32 = vld [vmem:[%s7086_s8 + $0x658] ss:$28 sps:$4 sm:$0xff]   ;;  %v5279_v33 = vld [vmem:[%s7086_s8 + $0x660] ss:$28 sps:$4 sm:$0xff]  }
 0x384   :  { %3717 = vmatprep.mubr.bf16.mxu0 %v6549_v34  ;;  %3799 = vmatprep.mubr.bf16.mxu1 %v6549_v34  ;;  %v5281_v31 = vld [vmem:[%s7086_s8 + $0x664] ss:$28 sps:$4 sm:$0xff]  }
 0x385   :  { %3718 = vmatmul.mubr.bf16.vlgmr.msra.gmra.mrb[8].mxu0 %v6557_v39  ;;  %3800 = vmatmul.mubr.bf16.vlgmr.msra.gmra.mrb[16].mxu1 %v6557_v39 }
 0x386   :  { %3727 = vmatpush1.bf16.msra.mxu0 %v5198_v35  ;;  %3809 = vmatpush1.bf16.msra.mxu1 %v5201_v36  ;;  %v1981_v35 = vrot.slane %v6539_v16, %v6214_v7  ;;  %v5284_v36 = vld [vmem:[%s7086_s8 + $0x694] ss:$28 sps:$4 sm:$0xff]  }
 0x387   :  { %3758 = vmatprep.mubr.bf16.mxu0 %v6567_v44  ;;  %3840 = vmatprep.mubr.bf16.mxu1 %v6567_v44  ;;  %v5285_v16 = vld [vmem:[%s7086_s8 + $0x698] ss:$28 sps:$4 sm:$0xff]  }
 0x388   :  { %3728 = vmatprep.subr.bf16.mxu0 %v5206_v42  ;;  %3810 = vmatprep.subr.bf16.mxu1 %v5209_v43  ;;  %v5287_v42 = vld [vmem:[%s7086_s8 + $0x69c] ss:$28 sps:$4 sm:$0xff]   ;;  %v5282_v43 = vld [vmem:[%s7086_s8 + $0x690] ss:$28 sps:$4 sm:$0xff]  }
 0x38a   :  { %3729 = vmatpush1.bf16.msra.mxu0 %v5204_v45  ;;  %3811 = vmatpush1.bf16.msra.mxu1 %v5207_v46  ;;  %v2226_v45 = vadd.f32 %v6547_v22, %v1981_v35  ;;  %v5290_v46 = vld [vmem:[%s7086_s8 + $0x6cc] ss:$28 sps:$4 sm:$0xff]   ;;  %v5352_v35 = vld [vmem:[%s7086_s8 + $0x600] ss:$28 sps:$4 sm:$0xff]  }
 0x38b   :  { %3730 = vmatprep.subr.bf16.mxu0 %v5212_v47  ;;  %3812 = vmatprep.subr.bf16.mxu1 %v5215_v48  ;;  %v5293_v47 = vld [vmem:[%s7086_s8 + $0x6d4] ss:$28 sps:$4 sm:$0xff]   ;;  %v5288_v48 = vld [vmem:[%s7086_s8 + $0x6c8] ss:$28 sps:$4 sm:$0xff]  }
 0x38c   :  { %v5291_v22 = vld [vmem:[%s7086_s8 + $0x6d0] ss:$28 sps:$4 sm:$0xff]  }
 0x38e   :  { %3731 = vmatpush1.bf16.msra.mxu0 %v5210_v49  ;;  %3813 = vmatpush1.bf16.msra.mxu1 %v5213_v50  ;;  %v2234_v49 = vmax.f32 %v2226_v45, 0.0  ;;  %v5296_v50 = vld [vmem:[%s7086_s8 + $0x14] ss:$28 sps:$4 sm:$0xff]  }
 0x38f   :  { %3732 = vmatprep.subr.bf16.mxu0 %v5218_v51  ;;  %3814 = vmatprep.subr.bf16.mxu1 %v5221_v52  ;;  %v5297_v51 = vld [vmem:[%s7086_s8 + $0x1d8] ss:$28 sps:$4 sm:$0xff]   ;;  %v5294_v52 = vld [vmem:[%s7086_s8 + $0x10] ss:$28 sps:$4 sm:$0xff]  }
 0x390   :  { %v5354_v45 = vld [vmem:[%s7086_s8 + $0x2b0] ss:$28 sps:$4 sm:$0xff]  }
 0x392   :  { %3733 = vmatpush1.bf16.msra.mxu0 %v5216_v53  ;;  %3815 = vmatpush1.bf16.msra.mxu1 %v5219_v54  ;;  %v6759_v53 = vpack.c.bf16 %v2234_v49, %v2234_v49  ;;  %v5298_v54 = vld [vmem:[%s7086_s8 + $0x18] ss:$28 sps:$4 sm:$0xff]   ;;  %v5363_v49 = vld [vmem:[%s7086_s8 + $0x4b0] ss:$28 sps:$4 sm:$0xff]  }
 0x393   :  { %3734 = vmatprep.subr.bf16.mxu0 %v5224_v55  ;;  %3816 = vmatprep.subr.bf16.mxu1 %v5227_v56  ;;  %v5301_v55 = vld [vmem:[%s7086_s8 + $0x4c] ss:$28 sps:$4 sm:$0xff]  }
 0x394   :  { %v5302_v56 = vld [vmem:[%s7086_s8 + $0x210] ss:$28 sps:$4 sm:$0xff]  }
 0x396   :  { %3735 = vmatpush1.bf16.msra.mxu0 %v5222_v57  ;;  %3817 = vmatpush1.bf16.msra.mxu1 %v5225_v58  ;;  %v5299_v57 = vld [vmem:[%s7086_s8 + $0x48] ss:$28 sps:$4 sm:$0xff]   ;;  %v5303_v58 = vld [vmem:[%s7086_s8 + $0x50] ss:$28 sps:$4 sm:$0xff]  }
 0x397   :  { %3736 = vmatprep.subr.bf16.mxu0 %v5230_v59  ;;  %3818 = vmatprep.subr.bf16.mxu1 %v5233_v60  ;;  %v5306_v59 = vld [vmem:[%s7086_s8 + $0x84] ss:$28 sps:$4 sm:$0xff]  }
 0x398   :  { %v5307_v60 = vld [vmem:[%s7086_s8 + $0x248] ss:$28 sps:$4 sm:$0xff]  }
 0x39a   :  { %3737 = vmatpush1.bf16.msra.mxu0 %v5228_v61  ;;  %3819 = vmatpush1.bf16.msra.mxu1 %v5231_v62  ;;  %v5304_v61 = vld [vmem:[%s7086_s8 + $0x80] ss:$28 sps:$4 sm:$0xff]  }
 0x39b   :  { %3738 = vmatprep.subr.bf16.mxu0 %v5236_v63  ;;  %3820 = vmatprep.subr.bf16.mxu1 %v5239_v0  ;;  %v5311_v62 = vld [vmem:[%s7086_s8 + $0xbc] ss:$28 sps:$4 sm:$0xff]  }
 0x39c   :  { %v5312_v63 = vld [vmem:[%s7086_s8 + $0x280] ss:$28 sps:$4 sm:$0xff]   ;;  %v5309_v0 = vld [vmem:[%s7086_s8 + $0xb8] ss:$28 sps:$4 sm:$0xff]  }
 0x39e   :  { %3739 = vmatpush1.bf16.msra.mxu0 %v5234_v1  ;;  %3821 = vmatpush1.bf16.msra.mxu1 %v5237_v2  ;;  %v5313_v1 = vld [vmem:[%s7086_s8 + $0xc0] ss:$28 sps:$4 sm:$0xff]   ;;  %v5316_v2 = vld [vmem:[%s7086_s8 + $0xf4] ss:$28 sps:$4 sm:$0xff]  }
 0x39f   :  { %3740 = vmatprep.subr.bf16.mxu0 %v5242_v3  ;;  %3822 = vmatprep.subr.bf16.mxu1 %v5245_v4  ;;  %v5317_v3 = vld [vmem:[%s7086_s8 + $0x2b8] ss:$28 sps:$4 sm:$0xff]   ;;  %v5314_v4 = vld [vmem:[%s7086_s8 + $0xf0] ss:$28 sps:$4 sm:$0xff]  }
 0x3a2   :  { %3741 = vmatpush1.bf16.msra.mxu0 %v5240_v5  ;;  %3823 = vmatpush1.bf16.msra.mxu1 %v5243_v6  ;;  %v5318_v5 = vld [vmem:[%s7086_s8 + $0xf8] ss:$28 sps:$4 sm:$0xff]   ;;  %v5321_v6 = vld [vmem:[%s7086_s8 + $0x12c] ss:$28 sps:$4 sm:$0xff]  }
 0x3a3   :  { %3742 = vmatprep.subr.bf16.mxu0 %v5248_v8  ;;  %3824 = vmatprep.subr.bf16.mxu1 %v5251_v9  ;;  %v5322_v8 = vld [vmem:[%s7086_s8 + $0x2f0] ss:$28 sps:$4 sm:$0xff]   ;;  %v5319_v9 = vld [vmem:[%s7086_s8 + $0x128] ss:$28 sps:$4 sm:$0xff]  }
 0x3a6   :  { %3743 = vmatpush1.bf16.msra.mxu0 %v5246_v10  ;;  %3825 = vmatpush1.bf16.msra.mxu1 %v5249_v11  ;;  %v5323_v10 = vld [vmem:[%s7086_s8 + $0x130] ss:$28 sps:$4 sm:$0xff]   ;;  %v5326_v11 = vld [vmem:[%s7086_s8 + $0x164] ss:$28 sps:$4 sm:$0xff]  }
 0x3a7   :  { %3744 = vmatprep.subr.bf16.mxu0 %v5254_v12  ;;  %3826 = vmatprep.subr.bf16.mxu1 %v5257_v13  ;;  %v5327_v12 = vld [vmem:[%s7086_s8 + $0x328] ss:$28 sps:$4 sm:$0xff]   ;;  %v5324_v13 = vld [vmem:[%s7086_s8 + $0x160] ss:$28 sps:$4 sm:$0xff]  }
 0x3aa   :  { %3745 = vmatpush1.bf16.msra.mxu0 %v5252_v14  ;;  %3827 = vmatpush1.bf16.msra.mxu1 %v5255_v15  ;;  %v5328_v14 = vld [vmem:[%s7086_s8 + $0x168] ss:$28 sps:$4 sm:$0xff]   ;;  %v5331_v15 = vld [vmem:[%s7086_s8 + $0x19c] ss:$28 sps:$4 sm:$0xff]  }
 0x3ab   :  { %3746 = vmatprep.subr.bf16.mxu0 %v5260_v18  ;;  %3828 = vmatprep.subr.bf16.mxu1 %v5263_v19  ;;  %v5332_v18 = vld [vmem:[%s7086_s8 + $0x360] ss:$28 sps:$4 sm:$0xff]   ;;  %v5329_v19 = vld [vmem:[%s7086_s8 + $0x198] ss:$28 sps:$4 sm:$0xff]  }
 0x3ae   :  { %3747 = vmatpush1.bf16.msra.mxu0 %v5258_v20  ;;  %3829 = vmatpush1.bf16.msra.mxu1 %v5261_v21  ;;  %v5333_v20 = vld [vmem:[%s7086_s8 + $0x1a0] ss:$28 sps:$4 sm:$0xff]   ;;  %v5336_v21 = vld [vmem:[%s7086_s8 + $0x1d4] ss:$28 sps:$4 sm:$0xff]  }
 0x3af   :  { %3748 = vmatprep.subr.bf16.mxu0 %v5266_v17  ;;  %3830 = vmatprep.subr.bf16.mxu1 %v5269_v23  ;;  %v5337_v17 = vld [vmem:[%s7086_s8 + $0x558] ss:$28 sps:$4 sm:$0xff]   ;;  %v5334_v23 = vld [vmem:[%s7086_s8 + $0x1d0] ss:$28 sps:$4 sm:$0xff]  }
 0x3b2   :  { %3749 = vmatpush1.bf16.msra.mxu0 %v5264_v24  ;;  %3831 = vmatpush1.bf16.msra.mxu1 %v5267_v25  ;;  %v5338_v24 = vld [vmem:[%s7086_s8 + $0x398] ss:$28 sps:$4 sm:$0xff]   ;;  %v5341_v25 = vld [vmem:[%s7086_s8 + $0x20c] ss:$28 sps:$4 sm:$0xff]  }
 0x3b3   :  { %3750 = vmatprep.subr.bf16.mxu0 %v5272_v26  ;;  %3832 = vmatprep.subr.bf16.mxu1 %v5275_v27  ;;  %v5342_v26 = vld [vmem:[%s7086_s8 + $0x590] ss:$28 sps:$4 sm:$0xff]   ;;  %v5339_v27 = vld [vmem:[%s7086_s8 + $0x208] ss:$28 sps:$4 sm:$0xff]  }
 0x3b6   :  { %3751 = vmatpush1.bf16.msra.mxu0 %v5270_v28  ;;  %3833 = vmatpush1.bf16.msra.mxu1 %v5273_v29  ;;  %v5343_v28 = vld [vmem:[%s7086_s8 + $0x3d0] ss:$28 sps:$4 sm:$0xff]   ;;  %v5346_v29 = vld [vmem:[%s7086_s8 + $0x244] ss:$28 sps:$4 sm:$0xff]  }
 0x3b7   :  { %3752 = vmatprep.subr.bf16.mxu0 %v5278_v30  ;;  %3834 = vmatprep.subr.bf16.mxu1 %v5281_v31  ;;  %v5347_v30 = vld [vmem:[%s7086_s8 + $0x5c8] ss:$28 sps:$4 sm:$0xff]   ;;  %v5344_v31 = vld [vmem:[%s7086_s8 + $0x240] ss:$28 sps:$4 sm:$0xff]  }
 0x3ba   :  { %3753 = vmatpush1.bf16.msra.mxu0 %v5276_v32  ;;  %3835 = vmatpush1.bf16.msra.mxu1 %v5279_v33  ;;  %v5348_v32 = vld [vmem:[%s7086_s8 + $0x408] ss:$28 sps:$4 sm:$0xff]   ;;  %v5351_v33 = vld [vmem:[%s7086_s8 + $0x27c] ss:$28 sps:$4 sm:$0xff]  }
 0x3bb   :  { %3754 = vmatprep.subr.bf16.mxu0 %v5284_v36  ;;  %3836 = vmatprep.subr.bf16.mxu1 %v5287_v42  ;;  %v5349_v36 = vld [vmem:[%s7086_s8 + $0x278] ss:$28 sps:$4 sm:$0xff]   ;;  %v5353_v42 = vld [vmem:[%s7086_s8 + $0x440] ss:$28 sps:$4 sm:$0xff]  }
 0x3be   :  { %3755 = vmatpush1.bf16.msra.mxu0 %v5282_v43  ;;  %3837 = vmatpush1.bf16.msra.mxu1 %v5285_v16  ;;  %v5356_v43 = vld [vmem:[%s7086_s8 + $0x2b4] ss:$28 sps:$4 sm:$0xff]  }
 0x3bf   :  { %3756 = vmatprep.subr.bf16.mxu0 %v5290_v46  ;;  %3838 = vmatprep.subr.bf16.mxu1 %v5293_v47  ;;  %v5357_v16 = vld [vmem:[%s7086_s8 + $0x638] ss:$28 sps:$4 sm:$0xff]   ;;  %v5361_v47 = vld [vmem:[%s7086_s8 + $0x2ec] ss:$28 sps:$4 sm:$0xff]  }
 0x3c0   :  { %v5358_v46 = vld [vmem:[%s7086_s8 + $0x478] ss:$28 sps:$4 sm:$0xff]  }
 0x3c2   :  { %3757 = vmatpush1.bf16.msra.mxu0 %v5288_v48  ;;  %3839 = vmatpush1.bf16.msra.mxu1 %v5291_v22  ;;  %v5362_v48 = vld [vmem:[%s7086_s8 + $0x670] ss:$28 sps:$4 sm:$0xff]   ;;  %v5359_v22 = vld [vmem:[%s7086_s8 + $0x2e8] ss:$28 sps:$4 sm:$0xff]  }
 0x3c3   :  { %3849 = vmatprep.subr.bf16.mxu0 %v5296_v50  ;;  %4637 = vmatprep.subr.bf16.mxu1 %v5297_v51  ;;  %v5366_v50 = vld [vmem:[%s7086_s8 + $0x324] ss:$28 sps:$4 sm:$0xff]  }
 0x3c4   :  { %v5367_v51 = vld [vmem:[%s7086_s8 + $0x6a8] ss:$28 sps:$4 sm:$0xff]  }
 0x3c5   :  { %3759 = vmatmul.mubr.bf16.vlgmr.msra.gmra.mrb[8].mxu0 %v6759_v53  ;;  %3841 = vmatmul.mubr.bf16.vlgmr.msra.gmra.mrb[16].mxu1 %v6759_v53 }
 0x3c6   :  { %3850 = vmatpush1.bf16.msra.mxu0 %v5294_v52  ;;  %3881 = vmatprep.mubr.bf16.mxu0 %v6549_v34  ;;  %v5364_v52 = vld [vmem:[%s7086_s8 + $0x320] ss:$28 sps:$4 sm:$0xff]  }
 0x3c7   :  { %4638 = vmatpush3.bf16.msra.mxu1 %v5298_v54  ;;  %3963 = vmatprep.mubr.bf16.mxu1 %v6549_v34  ;;  %v5308_v34 = vld [vmem:[%s7086_s8 + $0x88] ss:$28 sps:$4 sm:$0xff]  }
 0x3c8   :  { %3851 = vmatprep.subr.bf16.mxu0 %v5301_v55  ;;  %4639 = vmatprep.subr.bf16.mxu1 %v5302_v56  ;;  %v5368_v54 = vld [vmem:[%s7086_s8 + $0x4e8] ss:$28 sps:$4 sm:$0xff]   ;;  %v5371_v55 = vld [vmem:[%s7086_s8 + $0x35c] ss:$28 sps:$4 sm:$0xff]  }
 0x3c9   :  { %v5372_v56 = vld [vmem:[%s7086_s8 + $0x6e0] ss:$28 sps:$4 sm:$0xff]  }
 0x3ca   :  { %3852 = vmatpush1.bf16.msra.mxu0 %v5299_v57  ;;  %v5369_v57 = vld [vmem:[%s7086_s8 + $0x358] ss:$28 sps:$4 sm:$0xff]  }
 0x3cb   :  { %4640 = vmatpush3.bf16.msra.mxu1 %v5303_v58  ;;  %3853 = vmatprep.subr.bf16.mxu0 %v5306_v59  ;;  %v5373_v58 = vld [vmem:[%s7086_s8 + $0x520] ss:$28 sps:$4 sm:$0xff]   ;;  %v5376_v59 = vld [vmem:[%s7086_s8 + $0x394] ss:$28 sps:$4 sm:$0xff]  }
 0x3cc   :  { %4641 = vmatprep.subr.bf16.mxu1 %v5307_v60  ;;  %v5374_v60 = vld [vmem:[%s7086_s8 + $0x390] ss:$28 sps:$4 sm:$0xff]  }
 0x3ce   :  { %3854 = vmatpush1.bf16.msra.mxu0 %v5304_v61  ;;  %v5379_v61 = vld [vmem:[%s7086_s8 + $0x3cc] ss:$28 sps:$4 sm:$0xff]  }
 0x3cf   :  { %4642 = vmatpush3.bf16.msra.mxu1 %v5308_v34  ;;  %3855 = vmatprep.subr.bf16.mxu0 %v5311_v62  ;;  %v5377_v34 = vld [vmem:[%s7086_s8 + $0x3c8] ss:$28 sps:$4 sm:$0xff]  }
 0x3d0   :  { %4643 = vmatprep.subr.bf16.mxu1 %v5312_v63  ;;  %v5382_v62 = vld [vmem:[%s7086_s8 + $0x404] ss:$28 sps:$4 sm:$0xff]  }
 0x3d1   :  { %v5380_v63 = vld [vmem:[%s7086_s8 + $0x400] ss:$28 sps:$4 sm:$0xff]  }
 0x3d2   :  { %3856 = vmatpush1.bf16.msra.mxu0 %v5309_v0  ;;  %v5388_v0 = vld [vmem:[%s7086_s8 + $0x474] ss:$28 sps:$4 sm:$0xff]  }
 0x3d3   :  { %4644 = vmatpush3.bf16.msra.mxu1 %v5313_v1  ;;  %3857 = vmatprep.subr.bf16.mxu0 %v5316_v2  ;;  %v5386_v1 = vld [vmem:[%s7086_s8 + $0x470] ss:$28 sps:$4 sm:$0xff]  }
 0x3d4   :  { %4645 = vmatprep.subr.bf16.mxu1 %v5317_v3  ;;  %v5391_v2 = vld [vmem:[%s7086_s8 + $0x4ac] ss:$28 sps:$4 sm:$0xff]  }
 0x3d5   :  { %v5389_v3 = vld [vmem:[%s7086_s8 + $0x4a8] ss:$28 sps:$4 sm:$0xff]  }
 0x3d6   :  { %3858 = vmatpush1.bf16.msra.mxu0 %v5314_v4  ;;  %v5394_v4 = vld [vmem:[%s7086_s8 + $0x4e4] ss:$28 sps:$4 sm:$0xff]  }
 0x3d7   :  { %4646 = vmatpush3.bf16.msra.mxu1 %v5318_v5  ;;  %3859 = vmatprep.subr.bf16.mxu0 %v5321_v6  ;;  %v5392_v5 = vld [vmem:[%s7086_s8 + $0x4e0] ss:$28 sps:$4 sm:$0xff]  }
 0x3d8   :  { %4647 = vmatprep.subr.bf16.mxu1 %v5322_v8  ;;  %v5397_v6 = vld [vmem:[%s7086_s8 + $0x51c] ss:$28 sps:$4 sm:$0xff]  }
 0x3d9   :  { %v5395_v8 = vld [vmem:[%s7086_s8 + $0x518] ss:$28 sps:$4 sm:$0xff]  }
 0x3da   :  { %3860 = vmatpush1.bf16.msra.mxu0 %v5319_v9  ;;  %v5400_v9 = vld [vmem:[%s7086_s8 + $0x554] ss:$28 sps:$4 sm:$0xff]  }
 0x3db   :  { %4648 = vmatpush3.bf16.msra.mxu1 %v5323_v10  ;;  %3861 = vmatprep.subr.bf16.mxu0 %v5326_v11  ;;  %v5398_v10 = vld [vmem:[%s7086_s8 + $0x550] ss:$28 sps:$4 sm:$0xff]  }
 0x3dc   :  { %4649 = vmatprep.subr.bf16.mxu1 %v5327_v12  ;;  %v5403_v11 = vld [vmem:[%s7086_s8 + $0x58c] ss:$28 sps:$4 sm:$0xff]  }
 0x3dd   :  { %v5401_v12 = vld [vmem:[%s7086_s8 + $0x588] ss:$28 sps:$4 sm:$0xff]  }
 0x3de   :  { %3862 = vmatpush1.bf16.msra.mxu0 %v5324_v13  ;;  %v5406_v13 = vld [vmem:[%s7086_s8 + $0x5c4] ss:$28 sps:$4 sm:$0xff]  }
 0x3df   :  { %4650 = vmatpush3.bf16.msra.mxu1 %v5328_v14  ;;  %3863 = vmatprep.subr.bf16.mxu0 %v5331_v15  ;;  %v5404_v14 = vld [vmem:[%s7086_s8 + $0x5c0] ss:$28 sps:$4 sm:$0xff]  }
 0x3e0   :  { %4651 = vmatprep.subr.bf16.mxu1 %v5332_v18  ;;  %v5409_v15 = vld [vmem:[%s7086_s8 + $0x5fc] ss:$28 sps:$4 sm:$0xff]  }
 0x3e1   :  { %v5407_v18 = vld [vmem:[%s7086_s8 + $0x5f8] ss:$28 sps:$4 sm:$0xff]  }
 0x3e2   :  { %3864 = vmatpush1.bf16.msra.mxu0 %v5329_v19  ;;  %v5412_v19 = vld [vmem:[%s7086_s8 + $0x634] ss:$28 sps:$4 sm:$0xff]  }
 0x3e3   :  { %4652 = vmatpush3.bf16.msra.mxu1 %v5333_v20  ;;  %3865 = vmatprep.subr.bf16.mxu0 %v5336_v21  ;;  %v5410_v20 = vld [vmem:[%s7086_s8 + $0x630] ss:$28 sps:$4 sm:$0xff]  }
 0x3e4   :  { %4659 = vmatprep.subr.bf16.mxu1 %v5337_v17  ;;  %v5415_v21 = vld [vmem:[%s7086_s8 + $0x66c] ss:$28 sps:$4 sm:$0xff]  }
 0x3e5   :  { %v5413_v17 = vld [vmem:[%s7086_s8 + $0x668] ss:$28 sps:$4 sm:$0xff]  }
 0x3e6   :  { %3964 = vmatmul.mubr.bf16.vlgmr.msra.gmra.mrb[20].mxu1 %v6557_v39  ;;  %3866 = vmatpush1.bf16.msra.mxu0 %v5334_v23  ;;  %v5418_v23 = vld [vmem:[%s7086_s8 + $0x6a4] ss:$28 sps:$4 sm:$0xff]  }
 0x3e7   :  { %4660 = vmatpush3.bf16.msra.mxu1 %v5338_v24  ;;  %4003 = vmatprep.mubr.bf16.mxu1 %v6567_v44  ;;  %v5416_v24 = vld [vmem:[%s7086_s8 + $0x6a0] ss:$28 sps:$4 sm:$0xff]  }
 0x3e8   :  { %3867 = vmatprep.subr.bf16.mxu0 %v5341_v25  ;;  %4661 = vmatprep.subr.bf16.mxu1 %v5342_v26  ;;  %v5421_v25 = vld [vmem:[%s7086_s8 + $0x6dc] ss:$28 sps:$4 sm:$0xff]  }
 0x3e9   :  { %v5419_v26 = vld [vmem:[%s7086_s8 + $0x6d8] ss:$28 sps:$4 sm:$0xff]  }
 0x3ea   :  { %3868 = vmatpush1.bf16.msra.mxu0 %v5339_v27  ;;  %v7053_v27 = vld [vmem:[%s7090_s9] sm:$0x7f] }
 0x3eb   :  { %4662 = vmatpush3.bf16.msra.mxu1 %v5343_v28  ;;  %3869 = vmatprep.subr.bf16.mxu0 %v5346_v29  ;;  %v2501_v28 = vrot.slane %v7053_v27, %v6172_v38  ;;  %v2509_v29 = vrot.slane %v7053_v27, %v6214_v7 }
 0x3ec   :  { %4663 = vmatprep.subr.bf16.mxu1 %v5347_v30  ;;  %v2505_v30 = vrot.slane %v7053_v27, %v6178_v40 }
 0x3ee   :  { %3870 = vmatpush1.bf16.msra.mxu0 %v5344_v31  ;;  %v2513_v31 = vrot.slane %v7053_v27, %v6181_v41 }
 0x3ef   :  { %4664 = vmatpush3.bf16.msra.mxu1 %v5348_v32  ;;  %3871 = vmatprep.subr.bf16.mxu0 %v5351_v33 }
 0x3f0   :  { %4665 = vmatprep.subr.bf16.mxu1 %v5352_v35 }
 0x3f2   :  { %3872 = vmatpush1.bf16.msra.mxu0 %v5349_v36 }
 0x3f3   :  { %4666 = vmatpush3.bf16.msra.mxu1 %v5353_v42  ;;  %3873 = vmatprep.subr.bf16.mxu0 %v5356_v43 }
 0x3f4   :  { %4667 = vmatprep.subr.bf16.mxu1 %v5357_v16 }
 0x3f6   :  { %3874 = vmatpush1.bf16.msra.mxu0 %v5354_v45 }
 0x3f7   :  { %4668 = vmatpush3.bf16.msra.mxu1 %v5358_v46  ;;  %3875 = vmatprep.subr.bf16.mxu0 %v5361_v47 }
 0x3f8   :  { %4669 = vmatprep.subr.bf16.mxu1 %v5362_v48 }
 0x3fa   :  { %3876 = vmatpush1.bf16.msra.mxu0 %v5359_v22 }
 0x3fb   :  { %4670 = vmatpush3.bf16.msra.mxu1 %v5363_v49  ;;  %3877 = vmatprep.subr.bf16.mxu0 %v5366_v50 }
 0x3fc   :  { %4671 = vmatprep.subr.bf16.mxu1 %v5367_v51 }
 0x3fe   :  { %3878 = vmatpush1.bf16.msra.mxu0 %v5364_v52 }
 0x3ff   :  { %4672 = vmatpush3.bf16.msra.mxu1 %v5368_v54  ;;  %3879 = vmatprep.subr.bf16.mxu0 %v5371_v55 }
 0x400   :  { %4673 = vmatprep.subr.bf16.mxu1 %v5372_v56 }
 0x402   :  { %3880 = vmatpush1.bf16.msra.mxu0 %v5369_v57 }
 0x403   :  { %4674 = vmatpush3.bf16.msra.mxu1 %v5373_v58  ;;  %3890 = vmatprep.subr.bf16.mxu0 %v5376_v59 }
 0x405   :  { %3882 = vmatmul.mubr.bf16.vlgmr.msra.gmra.mrb[12].mxu0 %v6557_v39  ;;  %v5385_v39 = vld [vmem:[%s7086_s8 + $0x43c] ss:$28 sps:$4 sm:$0xff]  }
 0x406   :  { %4004 = vmatmul.mubr.bf16.vlgmr.msra.gmra.mrb[24].mxu1 %v6759_v53  ;;  %3891 = vmatpush1.bf16.msra.mxu0 %v5374_v60 }
 0x407   :  { %3922 = vmatprep.mubr.bf16.mxu0 %v6567_v44  ;;  %3892 = vmatprep.subr.bf16.mxu0 %v5379_v61  ;;  %v5383_v44 = vld [vmem:[%s7086_s8 + $0x438] ss:$28 sps:$4 sm:$0xff]  }
 0x40a   :  { %3893 = vmatpush1.bf16.msra.mxu0 %v5377_v34 }
 0x40b   :  { %3894 = vmatprep.subr.bf16.mxu0 %v5382_v62 }
 0x40e   :  { %3895 = vmatpush1.bf16.msra.mxu0 %v5380_v63 }
 0x40f   :  { %3896 = vmatprep.subr.bf16.mxu0 %v5385_v39 }
 0x412   :  { %3897 = vmatpush1.bf16.msra.mxu0 %v5383_v44 }
 0x413   :  { %3898 = vmatprep.subr.bf16.mxu0 %v5388_v0 }
 0x416   :  { %3899 = vmatpush1.bf16.msra.mxu0 %v5386_v1  ;;  %v2524_v1 = vsub.s32 6, %v6169_v37 }
 0x417   :  { %3900 = vmatprep.subr.bf16.mxu0 %v5391_v2 }
 0x418   :  { %v2525_v2 = vrot.slane %v7053_v27, %v2524_v1 }
 0x41a   :  { %3901 = vmatpush1.bf16.msra.mxu0 %v5389_v3 }
 0x41b   :  { %3902 = vmatprep.subr.bf16.mxu0 %v5394_v4 }
 0x41e   :  { %3903 = vmatpush1.bf16.msra.mxu0 %v5392_v5 }
 0x41f   :  { %3904 = vmatprep.subr.bf16.mxu0 %v5397_v6 }
 0x422   :  { %3905 = vmatpush1.bf16.msra.mxu0 %v5395_v8 }
 0x423   :  { %3906 = vmatprep.subr.bf16.mxu0 %v5400_v9 }
 0x426   :  { %3907 = vmatpush1.bf16.msra.mxu0 %v5398_v10 }
 0x427   :  { %3908 = vmatprep.subr.bf16.mxu0 %v5403_v11 }
 0x42a   :  { %3909 = vmatpush1.bf16.msra.mxu0 %v5401_v12 }
 0x42b   :  { %3910 = vmatprep.subr.bf16.mxu0 %v5406_v13 }
 0x42e   :  { %3911 = vmatpush1.bf16.msra.mxu0 %v5404_v14 }
 0x42f   :  { %3912 = vmatprep.subr.bf16.mxu0 %v5409_v15 }
 0x432   :  { %3913 = vmatpush1.bf16.msra.mxu0 %v5407_v18  ;;  %v2516_v18 = vsub.s32 4, %v6169_v37 }
 0x433   :  { %3914 = vmatprep.subr.bf16.mxu0 %v5412_v19  ;;  %v2520_v19 = vsub.s32 5, %v6169_v37 }
 0x436   :  { %3915 = vmatpush1.bf16.msra.mxu0 %v5410_v20  ;;  %v2517_v20 = vrot.slane %v7053_v27, %v2516_v18 }
 0x437   :  { %3916 = vmatprep.subr.bf16.mxu0 %v5415_v21  ;;  %v2521_v21 = vrot.slane %v7053_v27, %v2520_v19 }
 0x43a   :  { %3917 = vmatpush1.bf16.msra.mxu0 %v5413_v17 }
 0x43b   :  { %3918 = vmatprep.subr.bf16.mxu0 %v5418_v23 }
 0x43e   :  { %3919 = vmatpush1.bf16.msra.mxu0 %v5416_v24 }
 0x43f   :  { %3920 = vmatprep.subr.bf16.mxu0 %v5421_v25 }
 0x442   :  { %3921 = vmatpush1.bf16.msra.mxu0 %v5419_v26 }
 0x445   :  { %3923 = vmatmul.mubr.bf16.vlgmr.msra.gmra.mrb[12].mxu0 %v6759_v53 }
 0x498   :  { %v3760_v32 = vpop.f32.mrb[8].mxu0  ;;  %v3842_v33 = vpop.f32.mrb[16].mxu1 }
 0x499   :  { %v4685_v53 = vadd.f32 %v3760_v32, %v2501_v28  ;;  %v4687_v35 = vadd.f32 %v3842_v33, %v2509_v29  ;;  %v3762_v36 = vpop.f32.mrb[9].mxu0  ;;  %v3844_v42 = vpop.f32.mrb[17].mxu1 }
 0x49a   :  { %v4686_v43 = vadd.f32 %v3762_v36, %v2505_v30  ;;  %v4688_v16 = vadd.f32 %v3844_v42, %v2513_v31  ;;  %v3764_v45 = vpop.f32.mrb[10].mxu0  ;;  %v3846_v46 = vpop.f32.mrb[18].mxu1 }
 0x49b   :  { %v4578_v38 = vmul.f32 -1.442695, %v4685_v53  ;;  %v4580_v47 = vmul.f32 -1.442695, %v4687_v35  ;;  %v3765_v48 = vpop.f32.mrb[11].mxu0  ;;  %v3847_v7 = vpop.f32.mrb[19].mxu1 }
 0x49c   :  { %v4579_v22 = vmul.f32 -1.442695, %v4686_v43  ;;  %v4581_v49 = vmul.f32 -1.442695, %v4688_v16 }
 0x49d   :  { %5422 = vpow2.f32 %v4578_v38 }
 0x49e   :  { %5424 = vpow2.f32 %v4580_v47 }
 0x49f   :  { %5426 = vpow2.f32 %v4579_v22 }
 0x4a0   :  { %5428 = vpow2.f32 %v4581_v49 }
 0x4a7   :  { %v5423_v40 = vpop.eup %5422 }
 0x4a8   :  { %v5425_v41 = vpop.eup %5424  ;;  %v4032_v50 = vadd.f32 1.0, %v5423_v40 }
 0x4a9   :  { %v5427_v51 = vpop.eup %5426  ;;  %v4034_v52 = vadd.f32 1.0, %v5425_v41 }
 0x4aa   :  { %v5429_v54 = vpop.eup %5428  ;;  %5430 = vrcp.f32 %v4032_v50  ;;  %v4033_v55 = vadd.f32 1.0, %v5427_v51 }
 0x4ab   :  { %5432 = vrcp.f32 %v4034_v52  ;;  %v4035_v56 = vadd.f32 1.0, %v5429_v54 }
 0x4ac   :  { %5434 = vrcp.f32 %v4033_v55 }
 0x4ad   :  { %5436 = vrcp.f32 %v4035_v56 }
 0x4b4   :  { %v5431_v57 = vpop.eup %5430 }
 0x4b5   :  { %v5433_v58 = vpop.eup %5432 }
 0x4b6   :  { %v5435_v59 = vpop.eup %5434 }
 0x4b7   :  { %v5437_v60 = vpop.eup %5436  ;;  %v4589_v61 = vpack.c.bf16 %v5435_v59, %v5431_v57 }
 0x4b8   :  { %v4590_v34 = vpack.c.bf16 %v5437_v60, %v5433_v58 }
 0x4b9   :  { %4082 = vst [vmem:[%s7091_s10] sm:$0xff] %v4589_v61  ;;  %v4653_v62 = vpop.f32.mrb[20].mxu1 }
 0x4ba   :  { %4083 = vst [vmem:[%s7091_s10 + $0x8] sm:$0xff] %v4590_v34  ;;  %v4654_v63 = vpop.f32.mrb[21].mxu1 }
 0x4bb   :  { %v4655_v39 = vadd.f32 %v4654_v63, %v4653_v62  ;;  %v4656_v44 = vpop.f32.mrb[22].mxu1 }
 0x4bc   :  { %v4657_v0 = vpop.f32.mrb[23].mxu1 }
 0x4bd   :  { %v3966_v5 = vadd.f32 %v4655_v39, %v2525_v2 }
 0x4d9   :  { %v4675_v3 = vpop.f32.mrb[24].mxu1 }
 0x4da   :  { %v4676_v4 = vpop.f32.mrb[25].mxu1 }
 0x4db   :  { %v4677_v6 = vadd.f32 %v4676_v4, %v4675_v3  ;;  %v4678_v8 = vpop.f32.mrb[26].mxu1 }
 0x4dc   :  { %v4679_v9 = vpop.f32.mrb[27].mxu1 }
 0x4dd   :  { %v4006_v10 = vadd.f32 %v4677_v6, %v3966_v5 }
 0x4df   :  { %v4584_v11 = vmul.f32 -1.442695, %v4006_v10 }
 0x4e1   :  { %5438 = vpow2.f32 %v4584_v11 }
 0x4eb   :  { %v5439_v12 = vpop.eup %5438 }
 0x4ec   :  { %v4038_v13 = vadd.f32 1.0, %v5439_v12 }
 0x4ee   :  { %5440 = vrcp.f32 %v4038_v13 }
 0x4f8   :  { %v5441_v14 = vpop.eup %5440 }
 0x4f9   :  { %v4592_v15 = vpack.c.bf16 %v5441_v14, %v5441_v14 }
 0x4fb   :  { %4086 = vst.msk [vmem:[%s7091_s10 + $0x18] sm:$0xf] %vm4085_vm1, %v4592_v15 }
 0x518   :  { %v3924_v17 = vpop.f32.mrb[12].mxu0 }
 0x519   :  { %v4689_v23 = vadd.f32 %v3924_v17, %v2517_v20  ;;  %v3926_v24 = vpop.f32.mrb[13].mxu0 }
 0x51a   :  { %v4690_v25 = vadd.f32 %v3926_v24, %v2521_v21  ;;  %v3928_v26 = vpop.f32.mrb[14].mxu0 }
 0x51b   :  { %v4582_v28 = vmul.f32 -1.442695, %v4689_v23  ;;  %v3929_v29 = vpop.f32.mrb[15].mxu0 }
 0x51c   :  { %v4583_v30 = vmul.f32 -1.442695, %v4690_v25 }
 0x51d   :  { %5442 = vpow2.f32 %v4582_v28 }
 0x51e   :  { %5444 = vpow2.f32 %v4583_v30 }
 0x527   :  { %v5443_v31 = vpop.eup %5442 }
 0x528   :  { %v5445_v32 = vpop.eup %5444  ;;  %v4036_v33 = vadd.f32 1.0, %v5443_v31 }
 0x529   :  { %v4037_v53 = vadd.f32 1.0, %v5445_v32 }
 0x52a   :  { %5446 = vrcp.f32 %v4036_v33 }
 0x52b   :  { %5448 = vrcp.f32 %v4037_v53 }
 0x534   :  { %v5447_v37 = vpop.eup %5446 }
 0x535   :  { %v5449_v35 = vpop.eup %5448 }
 0x536   :  { %v4591_v36 = vpack.c.bf16 %v5449_v35, %v5447_v37 }
 0x538   :  { %4084 = vst [vmem:[%s7091_s10 + $0x10] sm:$0xff] %v4591_v36 }

</bundles_post_ra>
